<compile_context>
chip_gen: v6e
topology: v6e:2x2x1
jax: 0.10.0
libtpu: 0.0.40
codegen_flags: <defaults>
</compile_context>

<pallas_src>
import functools
import math

import jax
import jax.numpy as jnp
from jax import lax
from jax.experimental import pallas as pl
from jax.experimental.pallas import tpu as pltpu

LN_EPS = 1e-5                      # torch.nn.LayerNorm default
_NEG_INF = -1e30                   # softmax mask value for padded keys
_VMEM_LIMIT = 56 * 1024 * 1024     # < 64 MiB physical on v7x; ample headroom on v5e/v6e


# ----------------------------- in-kernel math helpers (f32) -----------------------------

def _layernorm(x, w, b):
    mu = jnp.mean(x, axis=-1, keepdims=True)
    xc = x - mu
    var = jnp.mean(xc * xc, axis=-1, keepdims=True)
    return xc * lax.rsqrt(var + LN_EPS) * w + b


def _gelu_exact(x):
    # nn.GELU() default = exact erf formulation
    return 0.5 * x * (1.0 + lax.erf(x * (1.0 / math.sqrt(2.0))))


def _softmax_lastdim(x):
    m = jnp.max(x, axis=-1, keepdims=True)
    e = jnp.exp(x - m)
    return e * pl.reciprocal(jnp.sum(e, axis=-1, keepdims=True), approx=True)


# ----------------------------------- Pallas kernels -------------------------------------

def _attn_residual_kernel(num_heads, n_valid,
                          x_ref, ln1_w_ref, ln1_b_ref, qkv_w_ref,
                          proj_w_ref, proj_b_ref,
                          out_ref, ctx_ref):
    """out = x + proj(multi_head_attention(layernorm1(x))), one batch element per step."""
    x = x_ref[0].astype(jnp.float32)                         # (Np, C)
    n_pad, C = x.shape
    hd = C // num_heads
    scale = hd ** (-0.5)

    # ---- norm1 + fused qkv projection (bf16 MXU operands, f32 accumulation) ----
    h = _layernorm(x, ln1_w_ref[0], ln1_b_ref[0])
    qkv = jnp.dot(h.astype(jnp.bfloat16), qkv_w_ref[...],
                  preferred_element_type=jnp.float32)        # (Np, 3C), qkv_bias=False
    qkv = qkv.astype(jnp.bfloat16)

    q_all = qkv[:, 0 * C:1 * C]
    k_all = qkv[:, 1 * C:2 * C]
    v_all = qkv[:, 2 * C:3 * C]

    key_mask = None
    if n_valid < n_pad:        # static condition: mask only exists when tokens are padded
        key_mask = lax.broadcasted_iota(jnp.int32, (n_pad, n_pad), 1) < n_valid

    # ---- per-head attention; context written directly into VMEM scratch (no concat) ----
    for hh in range(num_heads):
        q = q_all[:, hh * hd:(hh + 1) * hd]
        k = k_all[:, hh * hd:(hh + 1) * hd]
        v = v_all[:, hh * hd:(hh + 1) * hd]
        s = jnp.dot(q, k.T, preferred_element_type=jnp.float32) * scale   # (Np, Np)
        if key_mask is not None:
            s = jnp.where(key_mask, s, _NEG_INF)
        p = _softmax_lastdim(s)
        ctx_ref[:, hh * hd:(hh + 1) * hd] = jnp.dot(
            p.astype(jnp.bfloat16), v, preferred_element_type=jnp.float32)

    attn_out = jnp.dot(ctx_ref[...].astype(jnp.bfloat16), proj_w_ref[...],
                       preferred_element_type=jnp.float32) + proj_b_ref[0]
    out_ref[0] = (x + attn_out).astype(out_ref.dtype)


def _mlp_residual_kernel(x_ref, ln2_w_ref, ln2_b_ref,
                         fc1_w_ref, fc1_b_ref, fc2_w_ref, fc2_b_ref,
                         out_ref):
    """out = x + fc2(gelu(fc1(layernorm2(x)))), one token tile per grid step."""
    x = x_ref[0].astype(jnp.float32)                         # (tn, C)
    h = _layernorm(x, ln2_w_ref[0], ln2_b_ref[0])
    f = jnp.dot(h.astype(jnp.bfloat16), fc1_w_ref[...],
                preferred_element_type=jnp.float32) + fc1_b_ref[0]
    f = _gelu_exact(f)
    f = jnp.dot(f.astype(jnp.bfloat16), fc2_w_ref[...],
                preferred_element_type=jnp.float32) + fc2_b_ref[0]
    out_ref[0] = (x + f).astype(out_ref.dtype)


# -------------------------------------- wrappers -----------------------------------------

def _weight_spec(shape, n_grid_axes, single_buffer):
    index_map = (lambda b: (0, 0)) if n_grid_axes == 1 else (lambda b, t: (0, 0))
    if single_buffer:
        # Grid-invariant operand: keep one VMEM copy instead of the default double buffer.
        return pl.BlockSpec(shape, index_map, pipeline_mode=pl.Buffered(1))
    return pl.BlockSpec(shape, index_map)


def _run_padded_block(x_p, n_valid, num_heads, w, single_buffer):
    """x_p: (B, n_pad, C), zero-padded along tokens. Returns padded (B, n_pad, C) output."""
    B, n_pad, C = x_p.shape

    # ---------------- phase 1: x = x + Attn(LN1(x)) ----------------
    attn_weights = [w["ln1_w"], w["ln1_b"], w["qkv_w"], w["proj_w"], w["proj_b"]]
    attn_in_specs = [pl.BlockSpec((1, n_pad, C), lambda b: (b, 0, 0))]
    attn_in_specs += [_weight_spec(p.shape, 1, single_buffer) for p in attn_weights]

    x_attn = pl.pallas_call(
        functools.partial(_attn_residual_kernel, num_heads, n_valid),
        out_shape=jax.ShapeDtypeStruct((B, n_pad, C), x_p.dtype),
        grid_spec=pltpu.PrefetchScalarGridSpec(
            num_scalar_prefetch=0,
            grid=(B,),
            in_specs=attn_in_specs,
            out_specs=pl.BlockSpec((1, n_pad, C), lambda b: (b, 0, 0)),
            scratch_shapes=[pltpu.VMEM((n_pad, C), jnp.float32)],   # per-head context slab
        ),
        compiler_params=pltpu.CompilerParams(
            dimension_semantics=("parallel",),
            vmem_limit_bytes=_VMEM_LIMIT),
    )(x_p, *attn_weights)

    # ---------------- phase 2: x = x + Mlp(LN2(x)), token-tiled ----------------
    tn = 128 if n_pad % 128 == 0 else n_pad
    mlp_weights = [w["ln2_w"], w["ln2_b"], w["fc1_w"], w["fc1_b"], w["fc2_w"], w["fc2_b"]]
    mlp_in_specs = [pl.BlockSpec((1, tn, C), lambda b, t: (b, t, 0))]
    mlp_in_specs += [_weight_spec(p.shape, 2, single_buffer) for p in mlp_weights]

    out = pl.pallas_call(
        _mlp_residual_kernel,
        out_shape=jax.ShapeDtypeStruct((B, n_pad, C), x_p.dtype),
        grid_spec=pltpu.PrefetchScalarGridSpec(
            num_scalar_prefetch=0,
            grid=(B, n_pad // tn),
            in_specs=mlp_in_specs,
            out_specs=pl.BlockSpec((1, tn, C), lambda b, t: (b, t, 0)),
        ),
        compiler_params=pltpu.CompilerParams(
            dimension_semantics=("parallel", "parallel"),
            vmem_limit_bytes=_VMEM_LIMIT),
    )(x_attn, *mlp_weights)
    return out


def vit_block_pallas(x, params, num_heads):
    B, N, C = x.shape
    assert C % num_heads == 0

    # TODO(synk): if C must support non-lane-aligned sizes in production, pad the channel
    # dim too (real ViT dims 384/768/1024 are already multiples of 128, so only tokens
    # are padded here).
    seq_mult = 128 if N >= 128 else 8
    n_pad = ((N + seq_mult - 1) // seq_mult) * seq_mult
    x_p = x if n_pad == N else jnp.pad(x, ((0, 0), (0, n_pad - N), (0, 0)))

    wdt = jnp.bfloat16   # GEMM weights stored in bf16; LN params + biases stay f32
    w = {
        "ln1_w": params["ln1_w"].astype(jnp.float32),
        "ln1_b": params["ln1_b"].astype(jnp.float32),
        "qkv_w": params["qkv_w"].astype(wdt),
        "proj_w": params["proj_w"].astype(wdt),
        "proj_b": params["proj_b"].astype(jnp.float32),
        "ln2_w": params["ln2_w"].astype(jnp.float32),
        "ln2_b": params["ln2_b"].astype(jnp.float32),
        "fc1_w": params["fc1_w"].astype(wdt),
        "fc1_b": params["fc1_b"].astype(jnp.float32),
        "fc2_w": params["fc2_w"].astype(wdt),
        "fc2_b": params["fc2_b"].astype(jnp.float32),
    }

    try:
        out_p = _run_padded_block(x_p, N, num_heads, w, single_buffer=True)
    except Exception:
        # Older / stricter Pallas versions may reject pl.Buffered(1) on pallas_call
        # operands; fall back to default double-buffered weights (identical results).
        out_p = _run_padded_block(x_p, N, num_heads, w, single_buffer=False)

    return out_p[:, :N, :] if n_pad != N else out_p


# --------------------------------- pure-JAX reference ------------------------------------

def vit_block_reference(x, params, num_heads, matmul_dtype=jnp.float32):
    """Reference mirroring the PyTorch Block forward (quant=False).

    matmul_dtype=jnp.bfloat16 mirrors the kernel's bf16-operand / f32-accumulate GEMMs.
    """
    B, N, C = x.shape
    hd = C // num_heads
    scale = hd ** (-0.5)

    def mm(eq, a, b):
        return jnp.einsum(eq, a.astype(matmul_dtype), b.astype(matmul_dtype),
                          preferred_element_type=jnp.float32)

    def ln(v, wgt, b):
        mu = jnp.mean(v, axis=-1, keepdims=True)
        var = jnp.mean((v - mu) ** 2, axis=-1, keepdims=True)
        return (v - mu) / jnp.sqrt(var + LN_EPS) * wgt[0] + b[0]

    h = ln(x, params["ln1_w"], params["ln1_b"])
    qkv = mm("bnc,cd->bnd", h, params["qkv_w"])                        # (B, N, 3C)
    qkv = qkv.reshape(B, N, 3, num_heads, hd).transpose(2, 0, 3, 1, 4)
    q, k, v = qkv[0], qkv[1], qkv[2]                                   # (B, H, N, hd)
    attn = mm("bhnd,bhmd->bhnm", q, k) * scale
    attn = jax.nn.softmax(attn, axis=-1)
    ctx = mm("bhnm,bhmd->bhnd", attn, v)
    ctx = ctx.transpose(0, 2, 1, 3).reshape(B, N, C)
    x = x + (mm("bnc,cd->bnd", ctx, params["proj_w"]) + params["proj_b"][0])

    h2 = ln(x, params["ln2_w"], params["ln2_b"])
    f = mm("bnc,ch->bnh", h2, params["fc1_w"]) + params["fc1_b"][0]
    f = 0.5 * f * (1.0 + lax.erf(f / jnp.sqrt(2.0)))
    f = mm("bnh,hc->bnc", f, params["fc2_w"]) + params["fc2_b"][0]
    return x + f


def make_params(key, dim, num_heads, mlp_ratio=4.0):
    hidden = int(dim * mlp_ratio)
    ks = jax.random.split(key, 8)
    s = 0.05
    return {
        # LayerNorm params init like PyTorch (weight=1, bias=0), perturbed slightly
        # to keep them semantically active.
        "ln1_w": jnp.ones((1, dim), jnp.float32) + s * jax.random.normal(ks[0], (1, dim)),
        "ln1_b": s * jax.random.normal(ks[1], (1, dim), jnp.float32),
        "qkv_w": s * jax.random.normal(ks[2], (dim, 3 * dim), jnp.float32),
        "proj_w": s * jax.random.normal(ks[3], (dim, dim), jnp.float32),
        "proj_b": s * jax.random.normal(ks[4], (1, dim), jnp.float32),
        "ln2_w": jnp.ones((1, dim), jnp.float32) + s * jax.random.normal(ks[5], (1, dim)),
        "ln2_b": s * jax.random.normal(ks[6], (1, dim), jnp.float32),
        "fc1_w": s * jax.random.normal(ks[7], (dim, hidden), jnp.float32),
        "fc1_b": jnp.linspace(-0.1, 0.1, hidden, dtype=jnp.float32).reshape(1, hidden),
        "fc2_w": s * jax.random.normal(jax.random.fold_in(key, 99), (hidden, dim), jnp.float32),
        "fc2_b": jnp.linspace(-0.05, 0.05, dim, dtype=jnp.float32).reshape(1, dim),
    }


if __name__ == "__main__":
    key = jax.random.PRNGKey(0)

    # Case 1: small ViT-like shapes (batch=2, tokens=8, dim=32, heads=4, mlp hidden=128).
    B, N, C, H = 2, 8, 32, 4
    kx, kp = jax.random.split(key)
    x = jax.random.normal(kx, (B, N, C), jnp.float32)
    params = make_params(kp, C, H, mlp_ratio=4.0)

    out = jax.block_until_ready(vit_block_pallas(x, params, num_heads=H))
    assert out.shape == (B, N, C)

    ref_bf16 = vit_block_reference(x, params, H, matmul_dtype=jnp.bfloat16)
    ref_f32 = vit_block_reference(x, params, H, matmul_dtype=jnp.float32)
    assert jnp.allclose(out, ref_bf16, atol=1e-2, rtol=1e-2), \
        float(jnp.max(jnp.abs(out - ref_bf16)))
    assert jnp.allclose(out, ref_f32, atol=5e-2, rtol=5e-2), \
        float(jnp.max(jnp.abs(out - ref_f32)))

    # Case 2: token count not a multiple of 8 -> exercises the pad + key-mask path.
    N2 = 11
    x2 = jax.random.normal(jax.random.fold_in(key, 7), (B, N2, C), jnp.float32)
    out2 = jax.block_until_ready(vit_block_pallas(x2, params, num_heads=H))
    ref2 = vit_block_reference(x2, params, H, matmul_dtype=jnp.bfloat16)
    assert out2.shape == (B, N2, C)
    assert jnp.allclose(out2, ref2, atol=1e-2, rtol=1e-2), \
        float(jnp.max(jnp.abs(out2 - ref2)))

    print("KERNEL_OK")
</pallas_src>

<mosaic_0001>
module attributes {stable_mosaic.version = 11 : i64} {
  func.func @_attn_residual_kernel(%arg0: i32, %arg1: memref<1x8x32xf32, #tpu.memory_space<vmem>>, %arg2: memref<1x32xf32, #tpu.memory_space<vmem>>, %arg3: memref<1x32xf32, #tpu.memory_space<vmem>>, %arg4: memref<32x96xbf16, #tpu.memory_space<vmem>>, %arg5: memref<32x32xbf16, #tpu.memory_space<vmem>>, %arg6: memref<1x32xf32, #tpu.memory_space<vmem>>, %arg7: memref<1x8x32xf32, #tpu.memory_space<vmem>>, %arg8: memref<8x32xf32, #tpu.memory_space<vmem>>) attributes {dimension_semantics = [#tpu.dimension_semantics<parallel>], iteration_bounds = array<i64: 2>, scalar_prefetch = 0 : i64, scratch_operands = 1 : i64, tpu.core_type = #tpu.core_type<tc>, window_params = [{transform_indices = @transform_0, window_bounds = array<i64: 1, 8, 32>}, {pipeline_mode = #tpu.pipeline_mode<synchronous>, transform_indices = @transform_1, window_bounds = array<i64: 1, 32>}, {pipeline_mode = #tpu.pipeline_mode<synchronous>, transform_indices = @transform_2, window_bounds = array<i64: 1, 32>}, {pipeline_mode = #tpu.pipeline_mode<synchronous>, transform_indices = @transform_3, window_bounds = array<i64: 32, 96>}, {pipeline_mode = #tpu.pipeline_mode<synchronous>, transform_indices = @transform_4, window_bounds = array<i64: 32, 32>}, {pipeline_mode = #tpu.pipeline_mode<synchronous>, transform_indices = @transform_5, window_bounds = array<i64: 1, 32>}, {transform_indices = @transform_6, window_bounds = array<i64: 1, 8, 32>}]} {
    %c0 = arith.constant 0 : index
    %c0_0 = arith.constant 0 : index
    %c0_1 = arith.constant 0 : index
    %0 = vector.load %arg1[%c0, %c0_0, %c0_1] : memref<1x8x32xf32, #tpu.memory_space<vmem>>, vector<1x8x32xf32>
    %1 = vector.shape_cast %0 : vector<1x8x32xf32> to vector<8x32xf32>
    %c0_2 = arith.constant 0 : index
    %c0_3 = arith.constant 0 : index
    %2 = vector.load %arg2[%c0_2, %c0_3] : memref<1x32xf32, #tpu.memory_space<vmem>>, vector<1x32xf32>
    %3 = vector.shape_cast %2 : vector<1x32xf32> to vector<32xf32>
    %c0_4 = arith.constant 0 : index
    %c0_5 = arith.constant 0 : index
    %4 = vector.load %arg3[%c0_4, %c0_5] : memref<1x32xf32, #tpu.memory_space<vmem>>, vector<1x32xf32>
    %5 = vector.shape_cast %4 : vector<1x32xf32> to vector<32xf32>
    %cst = arith.constant dense<0.000000e+00> : vector<8xf32>
    %6 = vector.multi_reduction <add>, %1, %cst [1] : vector<8x32xf32> to vector<8xf32>
    %7 = vector.shape_cast %6 : vector<8xf32> to vector<8x1xf32>
    %cst_6 = arith.constant 3.200000e+01 : f32
    %8 = vector.broadcast %cst_6 : f32 to vector<8x1xf32>
    %9 = arith.divf %7, %8 : vector<8x1xf32>
    %10 = vector.broadcast %9 : vector<8x1xf32> to vector<8x32xf32>
    %11 = arith.subf %1, %10 : vector<8x32xf32>
    %12 = arith.mulf %11, %11 : vector<8x32xf32>
    %cst_7 = arith.constant dense<0.000000e+00> : vector<8xf32>
    %13 = vector.multi_reduction <add>, %12, %cst_7 [1] : vector<8x32xf32> to vector<8xf32>
    %14 = vector.shape_cast %13 : vector<8xf32> to vector<8x1xf32>
    %cst_8 = arith.constant 3.200000e+01 : f32
    %15 = vector.broadcast %cst_8 : f32 to vector<8x1xf32>
    %16 = arith.divf %14, %15 : vector<8x1xf32>
    %cst_9 = arith.constant 9.99999974E-6 : f32
    %17 = vector.broadcast %cst_9 : f32 to vector<8x1xf32>
    %18 = arith.addf %16, %17 : vector<8x1xf32>
    %19 = math.rsqrt %18 : vector<8x1xf32>
    %20 = vector.broadcast %19 : vector<8x1xf32> to vector<8x32xf32>
    %21 = arith.mulf %11, %20 : vector<8x32xf32>
    %22 = vector.shape_cast %3 : vector<32xf32> to vector<1x32xf32>
    %23 = vector.broadcast %22 : vector<1x32xf32> to vector<8x32xf32>
    %24 = arith.mulf %21, %23 : vector<8x32xf32>
    %25 = vector.shape_cast %5 : vector<32xf32> to vector<1x32xf32>
    %26 = vector.broadcast %25 : vector<1x32xf32> to vector<8x32xf32>
    %27 = arith.addf %24, %26 : vector<8x32xf32>
    %28 = arith.truncf %27 : vector<8x32xf32> to vector<8x32xbf16>
    %c0_10 = arith.constant 0 : index
    %c0_11 = arith.constant 0 : index
    %29 = vector.load %arg4[%c0_10, %c0_11] : memref<32x96xbf16, #tpu.memory_space<vmem>>, vector<32x96xbf16>
    %cst_12 = arith.constant dense<0.000000e+00> : vector<8x96xf32>
    %30 = tpu.matmul %28, %29, %cst_12 {dimension_numbers = #tpu.dot_dimension_numbers<[1], [0], [0], [1], [0, 0, 1, 1], [], []>} : vector<8x32xbf16>, vector<32x96xbf16>, vector<8x96xf32> -> vector<8x96xf32>
    %31 = arith.truncf %30 : vector<8x96xf32> to vector<8x96xbf16>
    %32 = vector.extract_strided_slice %31 {offsets = [0, 0], sizes = [8, 32], strides = [1, 1]} : vector<8x96xbf16> to vector<8x32xbf16>
    %33 = vector.extract_strided_slice %31 {offsets = [0, 32], sizes = [8, 32], strides = [1, 1]} : vector<8x96xbf16> to vector<8x32xbf16>
    %34 = vector.extract_strided_slice %31 {offsets = [0, 64], sizes = [8, 32], strides = [1, 1]} : vector<8x96xbf16> to vector<8x32xbf16>
    %35 = vector.extract_strided_slice %32 {offsets = [0, 0], sizes = [8, 8], strides = [1, 1]} : vector<8x32xbf16> to vector<8x8xbf16>
    %36 = vector.extract_strided_slice %33 {offsets = [0, 0], sizes = [8, 8], strides = [1, 1]} : vector<8x32xbf16> to vector<8x8xbf16>
    %37 = vector.extract_strided_slice %34 {offsets = [0, 0], sizes = [8, 8], strides = [1, 1]} : vector<8x32xbf16> to vector<8x8xbf16>
    %38 = tpu.transpose %36, [1, 0] : vector<8x8xbf16> -> vector<8x8xbf16>
    %cst_13 = arith.constant dense<0.000000e+00> : vector<8x8xf32>
    %39 = tpu.matmul %35, %38, %cst_13 {dimension_numbers = #tpu.dot_dimension_numbers<[1], [0], [0], [1], [0, 0, 1, 1], [], []>} : vector<8x8xbf16>, vector<8x8xbf16>, vector<8x8xf32> -> vector<8x8xf32>
    %cst_14 = arith.constant 0.353553385 : f32
    %40 = vector.broadcast %cst_14 : f32 to vector<8x8xf32>
    %41 = arith.mulf %39, %40 : vector<8x8xf32>
    %cst_15 = arith.constant dense<0xFF800000> : vector<8xf32>
    %42 = vector.multi_reduction <maximumf>, %41, %cst_15 [1] : vector<8x8xf32> to vector<8xf32>
    %43 = vector.shape_cast %42 : vector<8xf32> to vector<8x1xf32>
    %44 = vector.broadcast %43 : vector<8x1xf32> to vector<8x8xf32>
    %45 = arith.subf %41, %44 : vector<8x8xf32>
    %46 = math.exp %45 : vector<8x8xf32>
    %cst_16 = arith.constant dense<0.000000e+00> : vector<8xf32>
    %47 = vector.multi_reduction <add>, %46, %cst_16 [1] : vector<8x8xf32> to vector<8xf32>
    %48 = vector.shape_cast %47 : vector<8xf32> to vector<8x1xf32>
    %49 = tpu.reciprocal %48 {approx = true} : vector<8x1xf32> -> vector<8x1xf32>
    %50 = vector.broadcast %49 : vector<8x1xf32> to vector<8x8xf32>
    %51 = arith.mulf %46, %50 : vector<8x8xf32>
    %52 = arith.truncf %51 : vector<8x8xf32> to vector<8x8xbf16>
    %cst_17 = arith.constant dense<0.000000e+00> : vector<8x8xf32>
    %53 = tpu.matmul %52, %37, %cst_17 {dimension_numbers = #tpu.dot_dimension_numbers<[1], [0], [0], [1], [0, 0, 1, 1], [], []>} : vector<8x8xbf16>, vector<8x8xbf16>, vector<8x8xf32> -> vector<8x8xf32>
    %c0_18 = arith.constant 0 : index
    %c0_19 = arith.constant 0 : index
    %54 = vector.load %arg8[%c0_18, %c0_19] : memref<8x32xf32, #tpu.memory_space<vmem>>, vector<8x8xf32>
    tpu.vector_store %arg8[%c0_18, %c0_19], %53 {strides = array<i32>} : memref<8x32xf32, #tpu.memory_space<vmem>>, vector<8x8xf32>,
    %55 = vector.extract_strided_slice %32 {offsets = [0, 8], sizes = [8, 8], strides = [1, 1]} : vector<8x32xbf16> to vector<8x8xbf16>
    %56 = vector.extract_strided_slice %33 {offsets = [0, 8], sizes = [8, 8], strides = [1, 1]} : vector<8x32xbf16> to vector<8x8xbf16>
    %57 = vector.extract_strided_slice %34 {offsets = [0, 8], sizes = [8, 8], strides = [1, 1]} : vector<8x32xbf16> to vector<8x8xbf16>
    %58 = tpu.transpose %56, [1, 0] : vector<8x8xbf16> -> vector<8x8xbf16>
    %cst_20 = arith.constant dense<0.000000e+00> : vector<8x8xf32>
    %59 = tpu.matmul %55, %58, %cst_20 {dimension_numbers = #tpu.dot_dimension_numbers<[1], [0], [0], [1], [0, 0, 1, 1], [], []>} : vector<8x8xbf16>, vector<8x8xbf16>, vector<8x8xf32> -> vector<8x8xf32>
    %cst_21 = arith.constant 0.353553385 : f32
    %60 = vector.broadcast %cst_21 : f32 to vector<8x8xf32>
    %61 = arith.mulf %59, %60 : vector<8x8xf32>
    %cst_22 = arith.constant dense<0xFF800000> : vector<8xf32>
    %62 = vector.multi_reduction <maximumf>, %61, %cst_22 [1] : vector<8x8xf32> to vector<8xf32>
    %63 = vector.shape_cast %62 : vector<8xf32> to vector<8x1xf32>
    %64 = vector.broadcast %63 : vector<8x1xf32> to vector<8x8xf32>
    %65 = arith.subf %61, %64 : vector<8x8xf32>
    %66 = math.exp %65 : vector<8x8xf32>
    %cst_23 = arith.constant dense<0.000000e+00> : vector<8xf32>
    %67 = vector.multi_reduction <add>, %66, %cst_23 [1] : vector<8x8xf32> to vector<8xf32>
    %68 = vector.shape_cast %67 : vector<8xf32> to vector<8x1xf32>
    %69 = tpu.reciprocal %68 {approx = true} : vector<8x1xf32> -> vector<8x1xf32>
    %70 = vector.broadcast %69 : vector<8x1xf32> to vector<8x8xf32>
    %71 = arith.mulf %66, %70 : vector<8x8xf32>
    %72 = arith.truncf %71 : vector<8x8xf32> to vector<8x8xbf16>
    %cst_24 = arith.constant dense<0.000000e+00> : vector<8x8xf32>
    %73 = tpu.matmul %72, %57, %cst_24 {dimension_numbers = #tpu.dot_dimension_numbers<[1], [0], [0], [1], [0, 0, 1, 1], [], []>} : vector<8x8xbf16>, vector<8x8xbf16>, vector<8x8xf32> -> vector<8x8xf32>
    %c0_25 = arith.constant 0 : index
    %c8 = arith.constant 8 : index
    %74 = vector.load %arg8[%c0_25, %c8] : memref<8x32xf32, #tpu.memory_space<vmem>>, vector<8x8xf32>
    tpu.vector_store %arg8[%c0_25, %c8], %73 {strides = array<i32>} : memref<8x32xf32, #tpu.memory_space<vmem>>, vector<8x8xf32>,
    %75 = vector.extract_strided_slice %32 {offsets = [0, 16], sizes = [8, 8], strides = [1, 1]} : vector<8x32xbf16> to vector<8x8xbf16>
    %76 = vector.extract_strided_slice %33 {offsets = [0, 16], sizes = [8, 8], strides = [1, 1]} : vector<8x32xbf16> to vector<8x8xbf16>
    %77 = vector.extract_strided_slice %34 {offsets = [0, 16], sizes = [8, 8], strides = [1, 1]} : vector<8x32xbf16> to vector<8x8xbf16>
    %78 = tpu.transpose %76, [1, 0] : vector<8x8xbf16> -> vector<8x8xbf16>
    %cst_26 = arith.constant dense<0.000000e+00> : vector<8x8xf32>
    %79 = tpu.matmul %75, %78, %cst_26 {dimension_numbers = #tpu.dot_dimension_numbers<[1], [0], [0], [1], [0, 0, 1, 1], [], []>} : vector<8x8xbf16>, vector<8x8xbf16>, vector<8x8xf32> -> vector<8x8xf32>
    %cst_27 = arith.constant 0.353553385 : f32
    %80 = vector.broadcast %cst_27 : f32 to vector<8x8xf32>
    %81 = arith.mulf %79, %80 : vector<8x8xf32>
    %cst_28 = arith.constant dense<0xFF800000> : vector<8xf32>
    %82 = vector.multi_reduction <maximumf>, %81, %cst_28 [1] : vector<8x8xf32> to vector<8xf32>
    %83 = vector.shape_cast %82 : vector<8xf32> to vector<8x1xf32>
    %84 = vector.broadcast %83 : vector<8x1xf32> to vector<8x8xf32>
    %85 = arith.subf %81, %84 : vector<8x8xf32>
    %86 = math.exp %85 : vector<8x8xf32>
    %cst_29 = arith.constant dense<0.000000e+00> : vector<8xf32>
    %87 = vector.multi_reduction <add>, %86, %cst_29 [1] : vector<8x8xf32> to vector<8xf32>
    %88 = vector.shape_cast %87 : vector<8xf32> to vector<8x1xf32>
    %89 = tpu.reciprocal %88 {approx = true} : vector<8x1xf32> -> vector<8x1xf32>
    %90 = vector.broadcast %89 : vector<8x1xf32> to vector<8x8xf32>
    %91 = arith.mulf %86, %90 : vector<8x8xf32>
    %92 = arith.truncf %91 : vector<8x8xf32> to vector<8x8xbf16>
    %cst_30 = arith.constant dense<0.000000e+00> : vector<8x8xf32>
    %93 = tpu.matmul %92, %77, %cst_30 {dimension_numbers = #tpu.dot_dimension_numbers<[1], [0], [0], [1], [0, 0, 1, 1], [], []>} : vector<8x8xbf16>, vector<8x8xbf16>, vector<8x8xf32> -> vector<8x8xf32>
    %c0_31 = arith.constant 0 : index
    %c16 = arith.constant 16 : index
    %94 = vector.load %arg8[%c0_31, %c16] : memref<8x32xf32, #tpu.memory_space<vmem>>, vector<8x8xf32>
    tpu.vector_store %arg8[%c0_31, %c16], %93 {strides = array<i32>} : memref<8x32xf32, #tpu.memory_space<vmem>>, vector<8x8xf32>,
    %95 = vector.extract_strided_slice %32 {offsets = [0, 24], sizes = [8, 8], strides = [1, 1]} : vector<8x32xbf16> to vector<8x8xbf16>
    %96 = vector.extract_strided_slice %33 {offsets = [0, 24], sizes = [8, 8], strides = [1, 1]} : vector<8x32xbf16> to vector<8x8xbf16>
    %97 = vector.extract_strided_slice %34 {offsets = [0, 24], sizes = [8, 8], strides = [1, 1]} : vector<8x32xbf16> to vector<8x8xbf16>
    %98 = tpu.transpose %96, [1, 0] : vector<8x8xbf16> -> vector<8x8xbf16>
    %cst_32 = arith.constant dense<0.000000e+00> : vector<8x8xf32>
    %99 = tpu.matmul %95, %98, %cst_32 {dimension_numbers = #tpu.dot_dimension_numbers<[1], [0], [0], [1], [0, 0, 1, 1], [], []>} : vector<8x8xbf16>, vector<8x8xbf16>, vector<8x8xf32> -> vector<8x8xf32>
    %cst_33 = arith.constant 0.353553385 : f32
    %100 = vector.broadcast %cst_33 : f32 to vector<8x8xf32>
    %101 = arith.mulf %99, %100 : vector<8x8xf32>
    %cst_34 = arith.constant dense<0xFF800000> : vector<8xf32>
    %102 = vector.multi_reduction <maximumf>, %101, %cst_34 [1] : vector<8x8xf32> to vector<8xf32>
    %103 = vector.shape_cast %102 : vector<8xf32> to vector<8x1xf32>
    %104 = vector.broadcast %103 : vector<8x1xf32> to vector<8x8xf32>
    %105 = arith.subf %101, %104 : vector<8x8xf32>
    %106 = math.exp %105 : vector<8x8xf32>
    %cst_35 = arith.constant dense<0.000000e+00> : vector<8xf32>
    %107 = vector.multi_reduction <add>, %106, %cst_35 [1] : vector<8x8xf32> to vector<8xf32>
    %108 = vector.shape_cast %107 : vector<8xf32> to vector<8x1xf32>
    %109 = tpu.reciprocal %108 {approx = true} : vector<8x1xf32> -> vector<8x1xf32>
    %110 = vector.broadcast %109 : vector<8x1xf32> to vector<8x8xf32>
    %111 = arith.mulf %106, %110 : vector<8x8xf32>
    %112 = arith.truncf %111 : vector<8x8xf32> to vector<8x8xbf16>
    %cst_36 = arith.constant dense<0.000000e+00> : vector<8x8xf32>
    %113 = tpu.matmul %112, %97, %cst_36 {dimension_numbers = #tpu.dot_dimension_numbers<[1], [0], [0], [1], [0, 0, 1, 1], [], []>} : vector<8x8xbf16>, vector<8x8xbf16>, vector<8x8xf32> -> vector<8x8xf32>
    %c0_37 = arith.constant 0 : index
    %c24 = arith.constant 24 : index
    %114 = vector.load %arg8[%c0_37, %c24] : memref<8x32xf32, #tpu.memory_space<vmem>>, vector<8x8xf32>
    tpu.vector_store %arg8[%c0_37, %c24], %113 {strides = array<i32>} : memref<8x32xf32, #tpu.memory_space<vmem>>, vector<8x8xf32>,
    %c0_38 = arith.constant 0 : index
    %c0_39 = arith.constant 0 : index
    %115 = vector.load %arg8[%c0_38, %c0_39] : memref<8x32xf32, #tpu.memory_space<vmem>>, vector<8x32xf32>
    %116 = arith.truncf %115 : vector<8x32xf32> to vector<8x32xbf16>
    %c0_40 = arith.constant 0 : index
    %c0_41 = arith.constant 0 : index
    %117 = vector.load %arg5[%c0_40, %c0_41] : memref<32x32xbf16, #tpu.memory_space<vmem>>, vector<32x32xbf16>
    %cst_42 = arith.constant dense<0.000000e+00> : vector<8x32xf32>
    %118 = tpu.matmul %116, %117, %cst_42 {dimension_numbers = #tpu.dot_dimension_numbers<[1], [0], [0], [1], [0, 0, 1, 1], [], []>} : vector<8x32xbf16>, vector<32x32xbf16>, vector<8x32xf32> -> vector<8x32xf32>
    %c0_43 = arith.constant 0 : index
    %c0_44 = arith.constant 0 : index
    %119 = vector.load %arg6[%c0_43, %c0_44] : memref<1x32xf32, #tpu.memory_space<vmem>>, vector<1x32xf32>
    %120 = vector.shape_cast %119 : vector<1x32xf32> to vector<32xf32>
    %121 = vector.shape_cast %120 : vector<32xf32> to vector<1x32xf32>
    %122 = vector.broadcast %121 : vector<1x32xf32> to vector<8x32xf32>
    %123 = arith.addf %118, %122 : vector<8x32xf32>
    %124 = arith.addf %1, %123 : vector<8x32xf32>
    %c0_45 = arith.constant 0 : index
    %c0_46 = arith.constant 0 : index
    %c0_47 = arith.constant 0 : index
    %125 = vector.load %arg7[%c0_45, %c0_46, %c0_47] : memref<1x8x32xf32, #tpu.memory_space<vmem>>, vector<1x8x32xf32>
    %126 = vector.shape_cast %125 : vector<1x8x32xf32> to vector<8x32xf32>
    %127 = vector.shape_cast %124 : vector<8x32xf32> to vector<1x8x32xf32>
    tpu.vector_store %arg7[%c0_45, %c0_46, %c0_47], %127 {strides = array<i32>} : memref<1x8x32xf32, #tpu.memory_space<vmem>>, vector<1x8x32xf32>,
    return
  }
  func.func @transform_0(%arg0: i32) -> (i32, i32, i32) {
    %c0_i32 = arith.constant 0 : i32
    %c0_i32_0 = arith.constant 0 : i32
    %c0_i32_1 = arith.constant 0 : i32
    return %arg0, %c0_i32, %c0_i32_0 : i32, i32, i32
  }
  func.func @transform_1(%arg0: i32) -> (i32, i32) {
    %c0_i32 = arith.constant 0 : i32
    %c0_i32_0 = arith.constant 0 : i32
    %c0_i32_1 = arith.constant 0 : i32
    return %c0_i32, %c0_i32_0 : i32, i32
  }
  func.func @transform_2(%arg0: i32) -> (i32, i32) {
    %c0_i32 = arith.constant 0 : i32
    %c0_i32_0 = arith.constant 0 : i32
    %c0_i32_1 = arith.constant 0 : i32
    return %c0_i32, %c0_i32_0 : i32, i32
  }
  func.func @transform_3(%arg0: i32) -> (i32, i32) {
    %c0_i32 = arith.constant 0 : i32
    %c0_i32_0 = arith.constant 0 : i32
    %c0_i32_1 = arith.constant 0 : i32
    return %c0_i32, %c0_i32_0 : i32, i32
  }
  func.func @transform_4(%arg0: i32) -> (i32, i32) {
    %c0_i32 = arith.constant 0 : i32
    %c0_i32_0 = arith.constant 0 : i32
    %c0_i32_1 = arith.constant 0 : i32
    return %c0_i32, %c0_i32_0 : i32, i32
  }
  func.func @transform_5(%arg0: i32) -> (i32, i32) {
    %c0_i32 = arith.constant 0 : i32
    %c0_i32_0 = arith.constant 0 : i32
    %c0_i32_1 = arith.constant 0 : i32
    return %c0_i32, %c0_i32_0 : i32, i32
  }
  func.func @transform_6(%arg0: i32) -> (i32, i32, i32) {
    %c0_i32 = arith.constant 0 : i32
    %c0_i32_0 = arith.constant 0 : i32
    %c0_i32_1 = arith.constant 0 : i32
    return %arg0, %c0_i32, %c0_i32_0 : i32, i32, i32
  }
}

module attributes {stable_mosaic.version = 11 : i64} {
  func.func @_attn_residual_kernel(%arg0: i32, %arg1: memref<1x8x32xf32, #tpu.memory_space<vmem>>, %arg2: memref<1x32xf32, #tpu.memory_space<vmem>>, %arg3: memref<1x32xf32, #tpu.memory_space<vmem>>, %arg4: memref<32x96xbf16, #tpu.memory_space<vmem>>, %arg5: memref<32x32xbf16, #tpu.memory_space<vmem>>, %arg6: memref<1x32xf32, #tpu.memory_space<vmem>>, %arg7: memref<1x8x32xf32, #tpu.memory_space<vmem>>, %arg8: memref<8x32xf32, #tpu.memory_space<vmem>>) attributes {dimension_semantics = [#tpu.dimension_semantics<parallel>], iteration_bounds = array<i64: 2>, scalar_prefetch = 0 : i64, scratch_operands = 1 : i64, tpu.core_type = #tpu.core_type<tc>, window_params = [{transform_indices = @transform_0, window_bounds = array<i64: 1, 8, 32>}, {pipeline_mode = #tpu.pipeline_mode<synchronous>, transform_indices = @transform_1, window_bounds = array<i64: 1, 32>}, {pipeline_mode = #tpu.pipeline_mode<synchronous>, transform_indices = @transform_2, window_bounds = array<i64: 1, 32>}, {pipeline_mode = #tpu.pipeline_mode<synchronous>, transform_indices = @transform_3, window_bounds = array<i64: 32, 96>}, {pipeline_mode = #tpu.pipeline_mode<synchronous>, transform_indices = @transform_4, window_bounds = array<i64: 32, 32>}, {pipeline_mode = #tpu.pipeline_mode<synchronous>, transform_indices = @transform_5, window_bounds = array<i64: 1, 32>}, {transform_indices = @transform_6, window_bounds = array<i64: 1, 8, 32>}]} {
    %c0 = arith.constant 0 : index
    %c0_0 = arith.constant 0 : index
    %c0_1 = arith.constant 0 : index
    %0 = vector.load %arg1[%c0, %c0_0, %c0_1] : memref<1x8x32xf32, #tpu.memory_space<vmem>>, vector<1x8x32xf32>
    %1 = vector.shape_cast %0 : vector<1x8x32xf32> to vector<8x32xf32>
    %c0_2 = arith.constant 0 : index
    %c0_3 = arith.constant 0 : index
    %2 = vector.load %arg2[%c0_2, %c0_3] : memref<1x32xf32, #tpu.memory_space<vmem>>, vector<1x32xf32>
    %3 = vector.shape_cast %2 : vector<1x32xf32> to vector<32xf32>
    %c0_4 = arith.constant 0 : index
    %c0_5 = arith.constant 0 : index
    %4 = vector.load %arg3[%c0_4, %c0_5] : memref<1x32xf32, #tpu.memory_space<vmem>>, vector<1x32xf32>
    %5 = vector.shape_cast %4 : vector<1x32xf32> to vector<32xf32>
    %cst = arith.constant dense<0.000000e+00> : vector<8xf32>
    %6 = vector.multi_reduction <add>, %1, %cst [1] : vector<8x32xf32> to vector<8xf32>
    %7 = vector.shape_cast %6 : vector<8xf32> to vector<8x1xf32>
    %cst_6 = arith.constant 3.200000e+01 : f32
    %8 = vector.broadcast %cst_6 : f32 to vector<8x1xf32>
    %9 = arith.divf %7, %8 : vector<8x1xf32>
    %10 = vector.broadcast %9 : vector<8x1xf32> to vector<8x32xf32>
    %11 = arith.subf %1, %10 : vector<8x32xf32>
    %12 = arith.mulf %11, %11 : vector<8x32xf32>
    %cst_7 = arith.constant dense<0.000000e+00> : vector<8xf32>
    %13 = vector.multi_reduction <add>, %12, %cst_7 [1] : vector<8x32xf32> to vector<8xf32>
    %14 = vector.shape_cast %13 : vector<8xf32> to vector<8x1xf32>
    %cst_8 = arith.constant 3.200000e+01 : f32
    %15 = vector.broadcast %cst_8 : f32 to vector<8x1xf32>
    %16 = arith.divf %14, %15 : vector<8x1xf32>
    %cst_9 = arith.constant 9.99999974E-6 : f32
    %17 = vector.broadcast %cst_9 : f32 to vector<8x1xf32>
    %18 = arith.addf %16, %17 : vector<8x1xf32>
    %19 = math.rsqrt %18 : vector<8x1xf32>
    %20 = vector.broadcast %19 : vector<8x1xf32> to vector<8x32xf32>
    %21 = arith.mulf %11, %20 : vector<8x32xf32>
    %22 = vector.shape_cast %3 : vector<32xf32> to vector<1x32xf32>
    %23 = vector.broadcast %22 : vector<1x32xf32> to vector<8x32xf32>
    %24 = arith.mulf %21, %23 : vector<8x32xf32>
    %25 = vector.shape_cast %5 : vector<32xf32> to vector<1x32xf32>
    %26 = vector.broadcast %25 : vector<1x32xf32> to vector<8x32xf32>
    %27 = arith.addf %24, %26 : vector<8x32xf32>
    %28 = arith.truncf %27 : vector<8x32xf32> to vector<8x32xbf16>
    %c0_10 = arith.constant 0 : index
    %c0_11 = arith.constant 0 : index
    %29 = vector.load %arg4[%c0_10, %c0_11] : memref<32x96xbf16, #tpu.memory_space<vmem>>, vector<32x96xbf16>
    %cst_12 = arith.constant dense<0.000000e+00> : vector<8x96xf32>
    %30 = tpu.matmul %28, %29, %cst_12 {dimension_numbers = #tpu.dot_dimension_numbers<[1], [0], [0], [1], [0, 0, 1, 1], [], []>} : vector<8x32xbf16>, vector<32x96xbf16>, vector<8x96xf32> -> vector<8x96xf32>
    %31 = arith.truncf %30 : vector<8x96xf32> to vector<8x96xbf16>
    %32 = vector.extract_strided_slice %31 {offsets = [0, 0], sizes = [8, 32], strides = [1, 1]} : vector<8x96xbf16> to vector<8x32xbf16>
    %33 = vector.extract_strided_slice %31 {offsets = [0, 32], sizes = [8, 32], strides = [1, 1]} : vector<8x96xbf16> to vector<8x32xbf16>
    %34 = vector.extract_strided_slice %31 {offsets = [0, 64], sizes = [8, 32], strides = [1, 1]} : vector<8x96xbf16> to vector<8x32xbf16>
    %35 = vector.extract_strided_slice %32 {offsets = [0, 0], sizes = [8, 8], strides = [1, 1]} : vector<8x32xbf16> to vector<8x8xbf16>
    %36 = vector.extract_strided_slice %33 {offsets = [0, 0], sizes = [8, 8], strides = [1, 1]} : vector<8x32xbf16> to vector<8x8xbf16>
    %37 = vector.extract_strided_slice %34 {offsets = [0, 0], sizes = [8, 8], strides = [1, 1]} : vector<8x32xbf16> to vector<8x8xbf16>
    %38 = tpu.transpose %36, [1, 0] : vector<8x8xbf16> -> vector<8x8xbf16>
    %cst_13 = arith.constant dense<0.000000e+00> : vector<8x8xf32>
    %39 = tpu.matmul %35, %38, %cst_13 {dimension_numbers = #tpu.dot_dimension_numbers<[1], [0], [0], [1], [0, 0, 1, 1], [], []>} : vector<8x8xbf16>, vector<8x8xbf16>, vector<8x8xf32> -> vector<8x8xf32>
    %cst_14 = arith.constant 0.353553385 : f32
    %40 = vector.broadcast %cst_14 : f32 to vector<8x8xf32>
    %41 = arith.mulf %39, %40 : vector<8x8xf32>
    %cst_15 = arith.constant dense<0xFF800000> : vector<8xf32>
    %42 = vector.multi_reduction <maximumf>, %41, %cst_15 [1] : vector<8x8xf32> to vector<8xf32>
    %43 = vector.shape_cast %42 : vector<8xf32> to vector<8x1xf32>
    %44 = vector.broadcast %43 : vector<8x1xf32> to vector<8x8xf32>
    %45 = arith.subf %41, %44 : vector<8x8xf32>
    %46 = math.exp %45 : vector<8x8xf32>
    %cst_16 = arith.constant dense<0.000000e+00> : vector<8xf32>
    %47 = vector.multi_reduction <add>, %46, %cst_16 [1] : vector<8x8xf32> to vector<8xf32>
    %48 = vector.shape_cast %47 : vector<8xf32> to vector<8x1xf32>
    %49 = tpu.reciprocal %48 {approx = true} : vector<8x1xf32> -> vector<8x1xf32>
    %50 = vector.broadcast %49 : vector<8x1xf32> to vector<8x8xf32>
    %51 = arith.mulf %46, %50 : vector<8x8xf32>
    %52 = arith.truncf %51 : vector<8x8xf32> to vector<8x8xbf16>
    %cst_17 = arith.constant dense<0.000000e+00> : vector<8x8xf32>
    %53 = tpu.matmul %52, %37, %cst_17 {dimension_numbers = #tpu.dot_dimension_numbers<[1], [0], [0], [1], [0, 0, 1, 1], [], []>} : vector<8x8xbf16>, vector<8x8xbf16>, vector<8x8xf32> -> vector<8x8xf32>
    %c0_18 = arith.constant 0 : index
    %c0_19 = arith.constant 0 : index
    %54 = vector.load %arg8[%c0_18, %c0_19] : memref<8x32xf32, #tpu.memory_space<vmem>>, vector<8x8xf32>
    tpu.vector_store %arg8[%c0_18, %c0_19], %53 {strides = array<i32>} : memref<8x32xf32, #tpu.memory_space<vmem>>, vector<8x8xf32>,
    %55 = vector.extract_strided_slice %32 {offsets = [0, 8], sizes = [8, 8], strides = [1, 1]} : vector<8x32xbf16> to vector<8x8xbf16>
    %56 = vector.extract_strided_slice %33 {offsets = [0, 8], sizes = [8, 8], strides = [1, 1]} : vector<8x32xbf16> to vector<8x8xbf16>
    %57 = vector.extract_strided_slice %34 {offsets = [0, 8], sizes = [8, 8], strides = [1, 1]} : vector<8x32xbf16> to vector<8x8xbf16>
    %58 = tpu.transpose %56, [1, 0] : vector<8x8xbf16> -> vector<8x8xbf16>
    %cst_20 = arith.constant dense<0.000000e+00> : vector<8x8xf32>
    %59 = tpu.matmul %55, %58, %cst_20 {dimension_numbers = #tpu.dot_dimension_numbers<[1], [0], [0], [1], [0, 0, 1, 1], [], []>} : vector<8x8xbf16>, vector<8x8xbf16>, vector<8x8xf32> -> vector<8x8xf32>
    %cst_21 = arith.constant 0.353553385 : f32
    %60 = vector.broadcast %cst_21 : f32 to vector<8x8xf32>
    %61 = arith.mulf %59, %60 : vector<8x8xf32>
    %cst_22 = arith.constant dense<0xFF800000> : vector<8xf32>
    %62 = vector.multi_reduction <maximumf>, %61, %cst_22 [1] : vector<8x8xf32> to vector<8xf32>
    %63 = vector.shape_cast %62 : vector<8xf32> to vector<8x1xf32>
    %64 = vector.broadcast %63 : vector<8x1xf32> to vector<8x8xf32>
    %65 = arith.subf %61, %64 : vector<8x8xf32>
    %66 = math.exp %65 : vector<8x8xf32>
    %cst_23 = arith.constant dense<0.000000e+00> : vector<8xf32>
    %67 = vector.multi_reduction <add>, %66, %cst_23 [1] : vector<8x8xf32> to vector<8xf32>
    %68 = vector.shape_cast %67 : vector<8xf32> to vector<8x1xf32>
    %69 = tpu.reciprocal %68 {approx = true} : vector<8x1xf32> -> vector<8x1xf32>
    %70 = vector.broadcast %69 : vector<8x1xf32> to vector<8x8xf32>
    %71 = arith.mulf %66, %70 : vector<8x8xf32>
    %72 = arith.truncf %71 : vector<8x8xf32> to vector<8x8xbf16>
    %cst_24 = arith.constant dense<0.000000e+00> : vector<8x8xf32>
    %73 = tpu.matmul %72, %57, %cst_24 {dimension_numbers = #tpu.dot_dimension_numbers<[1], [0], [0], [1], [0, 0, 1, 1], [], []>} : vector<8x8xbf16>, vector<8x8xbf16>, vector<8x8xf32> -> vector<8x8xf32>
    %c0_25 = arith.constant 0 : index
    %c8 = arith.constant 8 : index
    %74 = vector.load %arg8[%c0_25, %c8] : memref<8x32xf32, #tpu.memory_space<vmem>>, vector<8x8xf32>
    tpu.vector_store %arg8[%c0_25, %c8], %73 {strides = array<i32>} : memref<8x32xf32, #tpu.memory_space<vmem>>, vector<8x8xf32>,
    %75 = vector.extract_strided_slice %32 {offsets = [0, 16], sizes = [8, 8], strides = [1, 1]} : vector<8x32xbf16> to vector<8x8xbf16>
    %76 = vector.extract_strided_slice %33 {offsets = [0, 16], sizes = [8, 8], strides = [1, 1]} : vector<8x32xbf16> to vector<8x8xbf16>
    %77 = vector.extract_strided_slice %34 {offsets = [0, 16], sizes = [8, 8], strides = [1, 1]} : vector<8x32xbf16> to vector<8x8xbf16>
    %78 = tpu.transpose %76, [1, 0] : vector<8x8xbf16> -> vector<8x8xbf16>
    %cst_26 = arith.constant dense<0.000000e+00> : vector<8x8xf32>
    %79 = tpu.matmul %75, %78, %cst_26 {dimension_numbers = #tpu.dot_dimension_numbers<[1], [0], [0], [1], [0, 0, 1, 1], [], []>} : vector<8x8xbf16>, vector<8x8xbf16>, vector<8x8xf32> -> vector<8x8xf32>
    %cst_27 = arith.constant 0.353553385 : f32
    %80 = vector.broadcast %cst_27 : f32 to vector<8x8xf32>
    %81 = arith.mulf %79, %80 : vector<8x8xf32>
    %cst_28 = arith.constant dense<0xFF800000> : vector<8xf32>
    %82 = vector.multi_reduction <maximumf>, %81, %cst_28 [1] : vector<8x8xf32> to vector<8xf32>
    %83 = vector.shape_cast %82 : vector<8xf32> to vector<8x1xf32>
    %84 = vector.broadcast %83 : vector<8x1xf32> to vector<8x8xf32>
    %85 = arith.subf %81, %84 : vector<8x8xf32>
    %86 = math.exp %85 : vector<8x8xf32>
    %cst_29 = arith.constant dense<0.000000e+00> : vector<8xf32>
    %87 = vector.multi_reduction <add>, %86, %cst_29 [1] : vector<8x8xf32> to vector<8xf32>
    %88 = vector.shape_cast %87 : vector<8xf32> to vector<8x1xf32>
    %89 = tpu.reciprocal %88 {approx = true} : vector<8x1xf32> -> vector<8x1xf32>
    %90 = vector.broadcast %89 : vector<8x1xf32> to vector<8x8xf32>
    %91 = arith.mulf %86, %90 : vector<8x8xf32>
    %92 = arith.truncf %91 : vector<8x8xf32> to vector<8x8xbf16>
    %cst_30 = arith.constant dense<0.000000e+00> : vector<8x8xf32>
    %93 = tpu.matmul %92, %77, %cst_30 {dimension_numbers = #tpu.dot_dimension_numbers<[1], [0], [0], [1], [0, 0, 1, 1], [], []>} : vector<8x8xbf16>, vector<8x8xbf16>, vector<8x8xf32> -> vector<8x8xf32>
    %c0_31 = arith.constant 0 : index
    %c16 = arith.constant 16 : index
    %94 = vector.load %arg8[%c0_31, %c16] : memref<8x32xf32, #tpu.memory_space<vmem>>, vector<8x8xf32>
    tpu.vector_store %arg8[%c0_31, %c16], %93 {strides = array<i32>} : memref<8x32xf32, #tpu.memory_space<vmem>>, vector<8x8xf32>,
    %95 = vector.extract_strided_slice %32 {offsets = [0, 24], sizes = [8, 8], strides = [1, 1]} : vector<8x32xbf16> to vector<8x8xbf16>
    %96 = vector.extract_strided_slice %33 {offsets = [0, 24], sizes = [8, 8], strides = [1, 1]} : vector<8x32xbf16> to vector<8x8xbf16>
    %97 = vector.extract_strided_slice %34 {offsets = [0, 24], sizes = [8, 8], strides = [1, 1]} : vector<8x32xbf16> to vector<8x8xbf16>
    %98 = tpu.transpose %96, [1, 0] : vector<8x8xbf16> -> vector<8x8xbf16>
    %cst_32 = arith.constant dense<0.000000e+00> : vector<8x8xf32>
    %99 = tpu.matmul %95, %98, %cst_32 {dimension_numbers = #tpu.dot_dimension_numbers<[1], [0], [0], [1], [0, 0, 1, 1], [], []>} : vector<8x8xbf16>, vector<8x8xbf16>, vector<8x8xf32> -> vector<8x8xf32>
    %cst_33 = arith.constant 0.353553385 : f32
    %100 = vector.broadcast %cst_33 : f32 to vector<8x8xf32>
    %101 = arith.mulf %99, %100 : vector<8x8xf32>
    %cst_34 = arith.constant dense<0xFF800000> : vector<8xf32>
    %102 = vector.multi_reduction <maximumf>, %101, %cst_34 [1] : vector<8x8xf32> to vector<8xf32>
    %103 = vector.shape_cast %102 : vector<8xf32> to vector<8x1xf32>
    %104 = vector.broadcast %103 : vector<8x1xf32> to vector<8x8xf32>
    %105 = arith.subf %101, %104 : vector<8x8xf32>
    %106 = math.exp %105 : vector<8x8xf32>
    %cst_35 = arith.constant dense<0.000000e+00> : vector<8xf32>
    %107 = vector.multi_reduction <add>, %106, %cst_35 [1] : vector<8x8xf32> to vector<8xf32>
    %108 = vector.shape_cast %107 : vector<8xf32> to vector<8x1xf32>
    %109 = tpu.reciprocal %108 {approx = true} : vector<8x1xf32> -> vector<8x1xf32>
    %110 = vector.broadcast %109 : vector<8x1xf32> to vector<8x8xf32>
    %111 = arith.mulf %106, %110 : vector<8x8xf32>
    %112 = arith.truncf %111 : vector<8x8xf32> to vector<8x8xbf16>
    %cst_36 = arith.constant dense<0.000000e+00> : vector<8x8xf32>
    %113 = tpu.matmul %112, %97, %cst_36 {dimension_numbers = #tpu.dot_dimension_numbers<[1], [0], [0], [1], [0, 0, 1, 1], [], []>} : vector<8x8xbf16>, vector<8x8xbf16>, vector<8x8xf32> -> vector<8x8xf32>
    %c0_37 = arith.constant 0 : index
    %c24 = arith.constant 24 : index
    %114 = vector.load %arg8[%c0_37, %c24] : memref<8x32xf32, #tpu.memory_space<vmem>>, vector<8x8xf32>
    tpu.vector_store %arg8[%c0_37, %c24], %113 {strides = array<i32>} : memref<8x32xf32, #tpu.memory_space<vmem>>, vector<8x8xf32>,
    %c0_38 = arith.constant 0 : index
    %c0_39 = arith.constant 0 : index
    %115 = vector.load %arg8[%c0_38, %c0_39] : memref<8x32xf32, #tpu.memory_space<vmem>>, vector<8x32xf32>
    %116 = arith.truncf %115 : vector<8x32xf32> to vector<8x32xbf16>
    %c0_40 = arith.constant 0 : index
    %c0_41 = arith.constant 0 : index
    %117 = vector.load %arg5[%c0_40, %c0_41] : memref<32x32xbf16, #tpu.memory_space<vmem>>, vector<32x32xbf16>
    %cst_42 = arith.constant dense<0.000000e+00> : vector<8x32xf32>
    %118 = tpu.matmul %116, %117, %cst_42 {dimension_numbers = #tpu.dot_dimension_numbers<[1], [0], [0], [1], [0, 0, 1, 1], [], []>} : vector<8x32xbf16>, vector<32x32xbf16>, vector<8x32xf32> -> vector<8x32xf32>
    %c0_43 = arith.constant 0 : index
    %c0_44 = arith.constant 0 : index
    %119 = vector.load %arg6[%c0_43, %c0_44] : memref<1x32xf32, #tpu.memory_space<vmem>>, vector<1x32xf32>
    %120 = vector.shape_cast %119 : vector<1x32xf32> to vector<32xf32>
    %121 = vector.shape_cast %120 : vector<32xf32> to vector<1x32xf32>
    %122 = vector.broadcast %121 : vector<1x32xf32> to vector<8x32xf32>
    %123 = arith.addf %118, %122 : vector<8x32xf32>
    %124 = arith.addf %1, %123 : vector<8x32xf32>
    %c0_45 = arith.constant 0 : index
    %c0_46 = arith.constant 0 : index
    %c0_47 = arith.constant 0 : index
    %125 = vector.load %arg7[%c0_45, %c0_46, %c0_47] : memref<1x8x32xf32, #tpu.memory_space<vmem>>, vector<1x8x32xf32>
    %126 = vector.shape_cast %125 : vector<1x8x32xf32> to vector<8x32xf32>
    %127 = vector.shape_cast %124 : vector<8x32xf32> to vector<1x8x32xf32>
    tpu.vector_store %arg7[%c0_45, %c0_46, %c0_47], %127 {strides = array<i32>} : memref<1x8x32xf32, #tpu.memory_space<vmem>>, vector<1x8x32xf32>,
    return
  }
  func.func @transform_0(%arg0: i32) -> (i32, i32, i32) {
    %c0_i32 = arith.constant 0 : i32
    %c0_i32_0 = arith.constant 0 : i32
    %c0_i32_1 = arith.constant 0 : i32
    return %arg0, %c0_i32, %c0_i32_0 : i32, i32, i32
  }
  func.func @transform_1(%arg0: i32) -> (i32, i32) {
    %c0_i32 = arith.constant 0 : i32
    %c0_i32_0 = arith.constant 0 : i32
    %c0_i32_1 = arith.constant 0 : i32
    return %c0_i32, %c0_i32_0 : i32, i32
  }
  func.func @transform_2(%arg0: i32) -> (i32, i32) {
    %c0_i32 = arith.constant 0 : i32
    %c0_i32_0 = arith.constant 0 : i32
    %c0_i32_1 = arith.constant 0 : i32
    return %c0_i32, %c0_i32_0 : i32, i32
  }
  func.func @transform_3(%arg0: i32) -> (i32, i32) {
    %c0_i32 = arith.constant 0 : i32
    %c0_i32_0 = arith.constant 0 : i32
    %c0_i32_1 = arith.constant 0 : i32
    return %c0_i32, %c0_i32_0 : i32, i32
  }
  func.func @transform_4(%arg0: i32) -> (i32, i32) {
    %c0_i32 = arith.constant 0 : i32
    %c0_i32_0 = arith.constant 0 : i32
    %c0_i32_1 = arith.constant 0 : i32
    return %c0_i32, %c0_i32_0 : i32, i32
  }
  func.func @transform_5(%arg0: i32) -> (i32, i32) {
    %c0_i32 = arith.constant 0 : i32
    %c0_i32_0 = arith.constant 0 : i32
    %c0_i32_1 = arith.constant 0 : i32
    return %c0_i32, %c0_i32_0 : i32, i32
  }
  func.func @transform_6(%arg0: i32) -> (i32, i32, i32) {
    %c0_i32 = arith.constant 0 : i32
    %c0_i32_0 = arith.constant 0 : i32
    %c0_i32_1 = arith.constant 0 : i32
    return %arg0, %c0_i32, %c0_i32_0 : i32, i32, i32
  }
}

</mosaic_0001>

<bundles_post_ra>
// kernel: tpu_custom_call.1
= control target key start
LH: loop header
LB: loop body
LE: loop exit
PB: predicated region body
PF: predicated region fallthrough
CT: control target
= control target key end

     0   :  { %s1731_s0 = inlined_call_operand.hbm [shape: f32[2,8,32], index: 0, kind: input, shape index: {}]   ;;  %s1732_s1 = inlined_call_operand.vmem [shape: f32[1,32], index: 1, kind: input, shape index: {}]   ;;  %s1733_s2 = inlined_call_operand.vmem [shape: f32[1,32], index: 2, kind: input, shape index: {}]   ;;  %s1734_s3 = inlined_call_operand.hbm [shape: bf16[32,96], index: 3, kind: input, shape index: {}]   ;;  %s1735_s4 = inlined_call_operand.hbm [shape: bf16[32,32], index: 4, kind: input, shape index: {}]   ;;  %s1736_s5 = inlined_call_operand.vmem [shape: f32[1,32], index: 5, kind: input, shape index: {}]   ;;  %s1737_s6 = inlined_call_operand.hbm [shape: f32[2,8,32], index: 6, kind: output, shape index: {}]  }
   0x1   :  { %1742 = sst [smem:[#allocation13_spill]] %s1734_s3 }
   0x2   :  { %11 = vsyncpa [#allocation4], 0 }
   0x3   :  { %13 = vsyncpa [#allocation4 + $0x1], 0 }
   0x4   :  { %14 = vsyncpa [#allocation7], 0 }
   0x5   :  { %15 = vsyncpa [#allocation5], 0 }
   0x6   :  { %17 = vsyncpa [#allocation5 + $0x1], 0  ;;  %s1460_s21 = smov 0   ;;  %s1462_s22 = smov 0  }
   0x7   :  { %s1464_s23 = smov 0   ;;  %s1466_s24 = smov 0  }
   0x8 LB: > { %s1481_s25 = sadd.s32 4294967295, %s1401_s24   ;;  %s1027_s26 = sadd.s32 4294967294, %s1401_s24   ;;  %s1401_s24 = sphi %s1466_s24, %s1761_s24   ;;  %s1397_s23 = sphi %s1464_s23, %s1760_s23   ;;  %s1393_s22 = sphi %s1462_s22, %s1759_s22   ;;  %s1389_s21 = sphi %s1460_s21, %s1758_s21  }
   0x9   : > { %p43_p0 = scmp.ne.s32.totalorder %s1393_s22, %s1389_s21  ;;  %p1738_p1 = scmp.eq.s32.totalorder %s1481_s25, 0 }
   0xa   : > { %p178_p3 = scmp.eq.s32.totalorder %s1027_s26, 1  ;;  %p1028_p5 = scmp.ge.s32.totalorder %s1401_s24, 1 }
   0xb   : > { %p1490_p4 = por %p1738_p1, %p43_p0  ;;  %p185_p7 = scmp.lt.s32.totalorder %s1401_s24, 3 }
   0xc   : > { %p1495_p6 = por %p178_p3, %p43_p0  ;;  %s1403_s30 = smov [#allocation6]  }
   0xd   : > { %s1743_s27 = scalar_select %p1490_p4, 1, 0 }
   0xe   : > { %s1744_s28 = scalar_select %p1495_p6, 1, 0 }
   0xf   : > { %p1500_p8 = pnand %p1028_p5, %p185_p7  ;;  %s203_s7 = sshll.u32 %s1403_s30, 4  ;;  %s204_s7 = int_to_ptr.vmem [resolvable:$true] %s203_s7 }
  0x10   : > { %s1404_s9 = smov [#allocation8]   ;;  %s1264_s11 = scalar_lea.vmem %s204_s7, 256 }
  0x11   : > { %s1745_s29 = scalar_select %p1500_p8, 1, 0 }
  0x12   : > { %p1158_p9 = pneg %p1500_p8  ;;  %s216_s10 = sshll.u32 %s1404_s9, 4  ;;  %s217_s10 = int_to_ptr.vmem [resolvable:$true] %s216_s10 }
  0x13   : > { %p1265_p13 = scmp.ne.s32.totalorder %s204_s7, %s1264_s11  ;;  %p1272_p5 = scmp.lt.s32.totalorder %s204_s7, %s204_s7 }
  0x14   : > { %p1509_p11 = pnand %p1158_p9, %p1738_p1  ;;  %p1273_p7 = scmp.lt.s32.totalorder %s1264_s11, %s1264_s11 }
  0x16   : > { %p1255_p12 = pneg %p1509_p11  ;;  %p1274_p10 = por %p1273_p7, %p1272_p5 }
  0x18   : > { %p1267_p0 = pnand %p1265_p13, %p1255_p12 }
  0x1a   : > { %p1268_p3 = pneg %p1267_p0 }
  0x1c   : > { %p1275_p9 = pnand %p1274_p10, %p1268_p3 }
  0x1e   : > { %1278 = shalt.err (!%p1275_p9)
}
  0x1f   : > { %s1405_s12 = smov 64   ;;  %s1406_s13 = smov 4  }
  0x20   : > { %s1747_s3 = sld [smem:[#allocation13_spill]]  ;;  %s1290_s16 = scalar_lea.vmem %s217_s10, 256 }
  0x21   : > { %p1291_p1 = scmp.ne.s32.totalorder %s217_s10, %s1290_s16  ;;  %p1298_p2 = scmp.lt.s32.totalorder %s217_s10, %s217_s10 }
  0x22   : > { %p1299_p6 = scmp.lt.s32.totalorder %s1290_s16, %s1290_s16 }
  0x23   : > { %p1293_p13 = pnand %p1291_p1, %p1255_p12 }
  0x24   : > { %p1300_p5 = por %p1299_p6, %p1298_p2 }
  0x25   : > { %p1294_p0 = pneg %p1293_p13 }
  0x26   : > { %1161 = dma.hbm_to_vmem [thread:$0]  (!%p1509_p11), %s1747_s3, 256, %s204_s7, [#allocation7], %s1405_s12, %s1405_s12, %s1406_s13  }
  0x27   : > { %p1301_p10 = pnand %p1300_p5, %p1294_p0 }
  0x29   : > { %1304 = shalt.err (!%p1301_p10)
}
  0x2a   : > { %1164 = dma.hbm_to_vmem [thread:$0]  (!%p1509_p11), %s1735_s4, 256, %s217_s10, [#allocation7], %s1405_s12, %s1405_s12, %s1406_s13  }
  0x2b   : > { %s1532_s19 = sadd.s32 1, %s1401_s24   ;;  %s30_s20 = sadd.s32 1, %s1397_s23 }
  0x2c   : > { %s27_s26 = ssub.s32 %s1401_s24, %s1532_s19  ;;  %p37_p1 = scmp.ne.s32.totalorder %s1397_s23, %s1393_s22 }
  0x2d   : > { %p28_p2 = scmp.eq.s32.totalorder %s27_s26, 0  ;;  %p38_p6 = scmp.eq.s32.totalorder %s1401_s24, 0 }
  0x2e   : > { %p1748_p12 = scmp.eq.s32.totalorder %s1481_s25, 1  ;;  %p1175_p7 = scmp.lt.s32.totalorder %s1401_s24, 2 }
  0x2f   : > { %s1548_s7 = scalar_select %p28_p2, %s1397_s23, %s30_s20  }
  0x30   : > { %p1542_p3 = por %p1748_p12, %p37_p1  ;;  %p39_p9 = por %p38_p6, %p37_p1 }
  0x31   : > { %s233_s8 = sand.u32 1, %s1397_s23   ;;  %s1033_s10 = sshll.u32 %s1401_s24, 7 }
  0x32   : > { %s1749_s30 = scalar_select %p1542_p3, 1, 0 }
  0x33   : > { %s1032_s9 = sshll.u32 %s233_s8, 3  ;;  %s1555_s13 = scalar_lea.hbm %s1731_s0, %s1033_s10 }
  0x34   : > { %s237_s14 = scalar_lea.vmem [#allocation3], %s1032_s9  ;;  %p1557_p11 = pnand %p1175_p7, %p39_p9 }
  0x35   : > { %s244_s15 = sshll.u32 %s237_s14, 4  ;;  %s234_s17 = scalar_lea.sflag [#allocation4], %s233_s8  ;;  %s245_s15 = int_to_ptr.vmem [resolvable:$true] %s244_s15 }
  0x36   : > { %s1305_s18 = scalar_lea.hbm %s1555_s13, 128  ;;  %p1307_p0 = pneg %p1557_p11 }
  0x37   : > { %p1306_p13 = scmp.ne.s32.totalorder %s1555_s13, %s1305_s18  ;;  %s1310_s10 = scalar_lea.hbm %s1731_s0, 256 }
  0x38   : > { %p1311_p1 = scmp.lt.s32.totalorder %s1555_s13, %s1731_s0  ;;  %p1312_p2 = scmp.lt.s32.totalorder %s1310_s10, %s1305_s18 }
  0x39   : > { %p1308_p5 = pnand %p1307_p0, %p1306_p13 }
  0x3a   : > { %p1313_p6 = por %p1312_p2, %p1311_p1 }
  0x3b   : > { %p1309_p10 = pneg %p1308_p5 }
  0x3d   : > { %p1314_p12 = pnand %p1313_p6, %p1309_p10 }
  0x3f   : > { %1317 = shalt.err (!%p1314_p12)
}
  0x40   : > { %s1318_s12 = scalar_lea.vmem %s245_s15, 128  ;;  %s1407_s8 = smov [#allocation3]  }
  0x41   : > { %p1319_p7 = scmp.ne.s32.totalorder %s245_s15, %s1318_s12  ;;  %s1323_s14 = sshll.u32 %s1407_s8, 4  ;;  %s1324_s14 = int_to_ptr.vmem [resolvable:$false] %s1323_s14 }
  0x42   : > { %s1325_s3 = scalar_lea.vmem %s1324_s14, 256  ;;  %p1326_p13 = scmp.lt.s32.totalorder %s245_s15, %s1324_s14 }
  0x43   : > { %p1321_p9 = pnand %p1319_p7, %p1307_p0  ;;  %p1327_p5 = scmp.lt.s32.totalorder %s1325_s3, %s1318_s12 }
  0x45   : > { %p1322_p3 = pneg %p1321_p9  ;;  %p1328_p4 = por %p1327_p5, %p1326_p13 }
  0x47   : > { %p1329_p8 = pnand %p1328_p4, %p1322_p3 }
  0x49   : > { %1332 = shalt.err (!%p1329_p8)
}
  0x4a   : > { %1168 = dma.hbm_to_vmem [thread:$0]  (!%p1557_p11), %s1555_s13, 128, %s245_s15, %s234_s17  }
  0x4b   : > { %p1751_p10 = scmp.ne.s32.totalorder %s1745_s29, 0 }
  0x4c   : > { %s1578_s18 = sand.u32 (!%p1751_p10), 1, %s1393_s22   ;;  %p1752_p4 = scmp.ne.s32.totalorder (!%p1751_p10), %s1743_s27, 0 }
  0x4d   : > { %253 = sbr.rel (%p1751_p10) target bundleno = 1814 (0x716), region = 44  ;;  %s1035_s20 = sshll.u32 (!%p1751_p10), %s1578_s18, 3 }
  0x4e   : > { %s256_s26 = scalar_lea.sflag (!%p1751_p10), [#allocation4], %s1578_s18  ;;  %s259_s3 = scalar_lea.vmem (!%p1751_p10), [#allocation3], %s1035_s20 }
  0x52   : > { %1376 = dma.done.wait (%p1752_p4), %s256_s26, 128  }
  0x53   : > { %1378 = vsyncadd (%p1752_p4), %s256_s26, 4294967168  ;;  %p1753_p8 = scmp.eq.s32.totalorder %s1481_s25, 0 }
  0x55   : > { %1380 = dma.done.wait (%p1753_p8), [#allocation7], 512   ;;  %p1754_p3 = pmov %p1753_p8 }
  0x56   : > { %vm300_vm0 = vcmask 261120   ;;  %v1592_v0 = vld [vmem:[%s259_s3] sm:$0xff]  ;;  %v1231_v7 = vld [vmem:[#allocation6 + $0x8] sm:$0xff]   ;;  %v1408_v8 = vmov 0.0   ;;  %vm1409_vm1 = vmmov 0   ;;  %v1232_v9 = vld [vmem:[#allocation6] sm:$0xff]  }
  0x57   : > { %1382 = vsyncadd (%p1754_p3), [#allocation7], 4294966784  ;;  %v301_v1 = vsel %vm300_vm0, %v1592_v0, 0.0  ;;  %1082 = vmatprep.subr.bf16.mxu0 %v1408_v8  ;;  %1086 = vmatprep.mubr.msk.bf16.mxu0 %vm1409_vm1, %v1408_v8  ;;  %v1039_v14 = vld [vmem:[%s1732_s1] ss:$0 sm:$0xff]  ;;  %s1410_s16 = smov 120  }
  0x58   : > { %302 = vadd.xlane.f32.xlu0 %v301_v1  ;;  %1083 = vmatpush3.bf16.msra.mxu0 %v1231_v7  ;;  %v1040_v16 = vld [vmem:[%s1733_s2] ss:$0 sm:$0xff]  ;;  %s1411_s17 = smov 96   ;;  %s1412_s10 = smov 88   ;;  %vm393_vm2 = vcmask 64512   ;;  %vm458_vm3 = vcmask 1043456  }
  0x59   : > { %1090 = vmatprep.subr.bf16.mxu1 %v1408_v8  ;;  %1084 = vmatprep.subr.bf16.mxu0 %v1408_v8  ;;  %s1413_s11 = smov 80   ;;  %s1414_s9 = smov 112   ;;  %vm618_vm4 = vcmask 130112   ;;  %vm735_vm5 = vcmask 195712   ;;  %vm852_vm6 = vcmask 261312  }
  0x5a   : > { %1092 = vmatprep.mubr.msk.bf16.mxu1 %vm1409_vm1, %v1408_v8  ;;  %s1415_s12 = smov 72   ;;  %s1416_s8 = smov 104  }
  0x5b   : > { %s1417_s14 = smov 64   ;;  %s1418_s26 = smov 56  }
  0x5c   : > { %1085 = vmatpush3.bf16.msra.mxu0 %v1232_v9  ;;  %s1419_s3 = smov 48   ;;  %s1420_s27 = smov 40  }
  0x5d   : > { %1096 = vmatprep.subr.bf16.mxu0 %v1408_v8  ;;  %s1421_s29 = smov 8   ;;  %s1422_s13 = smov 16  }
  0x5e   : > { %s1423_s15 = smov 24   ;;  %p1755_p0 = scmp.ne.s32.totalorder %s1749_s30, 0 }
  0xe1   : > { %v303_v2 = vpop.xlane.xlu0 %302 }
  0xe2   : > { %v305_v3 = vmul.f32 0.03125, %v303_v2 }
  0xe4   : > { %v306_v4 = vsub.f32 %v1592_v0, %v305_v3 }
  0xe6   : > { %v307_v5 = vmul.f32 %v306_v4, %v306_v4 }
  0xe8   : > { %v308_v6 = vsel %vm300_vm0, %v307_v5, 0.0 }
  0xe9   : > { %309 = vadd.xlane.f32.xlu0 %v308_v6 }
 0x172   : > { %v310_v10 = vpop.xlane.xlu0 %309 }
 0x173   : > { %v311_v11 = vmul.f32 0.03125, %v310_v10 }
 0x175   : > { %v312_v12 = vadd.f32 1e-05, %v311_v11 }
 0x177   : > { %1235 = vrsqrt.f32 %v312_v12 }
 0x184   : > { %v1236_v13 = vpop.eup %1235 }
 0x185   : > { %v314_v15 = vmul.f32 %v1236_v13, %v306_v4 }
 0x187   : > { %v321_v17 = vmul.f32 %v1039_v14, %v314_v15 }
 0x189   : > { %v328_v18 = vadd.f32 %v1040_v16, %v321_v17 }
 0x18b   : > { %v329_v19 = vpack.c.bf16 %v328_v18, %v328_v18 }
 0x18d   : > { %1087 = vmatmul.mubr.msk.bf16.vlgmr.msra.gmra.mxu0 %vm300_vm0, %v329_v19 }
 0x18e   : > { %1098 = vmatprep.mubr.msk.bf16.mxu0 %vm1409_vm1, %v1408_v8 }
 0x24d   : > { %v383_v20 = vpop.f32.mrf.mxu0 }
 0x24e   : > { %v1615_v21 = vpack.c.bf16 %v383_v20, %v383_v20 }
 0x24f   : > { %v1088_v22 = vpop.f32.mrf.mxu0 }
 0x250   : > { %503 = vrot.lane.b32.xlu0 %v1615_v21, %s1410_s16  ;;  %391 = vrot.lane.b32.xlu1 %v1615_v21, %s1411_s17 }
 0x251   : > { %v386_v23 = vpop.f32.mrf.mxu0 }
 0x253   : > { %v1089_v24 = vpop.f32.mrf.mxu0 }
 0x254   : > { %505 = vrot.lane.b32.xlu1 %v1615_v21, %s1412_s10  ;;  %s1057_s10 = sshll.u32 %s1481_s25, 7  ;;  %s925_s25 = scalar_lea.sflag [#allocation5], %s1578_s18 }
 0x258   : > { %622 = vrot.lane.b32.xlu1 %v1615_v21, %s1413_s11  ;;  %s295_s11 = scalar_lea.vmem [#allocation9], %s1035_s20 }
 0x25c   : > { %620 = vrot.lane.b32.xlu1 %v1615_v21, %s1414_s9  ;;  %s938_s9 = sshll.u32 %s295_s11, 4  ;;  %s1689_s9 = int_to_ptr.vmem [resolvable:$true] %s938_s9 }
 0x25d   : > { %s1333_s20 = scalar_lea.vmem %s1689_s9, 128 }
 0x25e   : > { %p1334_p11 = scmp.ne.s32.totalorder %s1689_s9, %s1333_s20 }
 0x260   : > { %739 = vrot.lane.b32.xlu1 %v1615_v21, %s1415_s12  ;;  %p1335_p1 = pnand %p1334_p11, %p1755_p0 }
 0x262   : > { %p1336_p2 = pneg %p1335_p1 }
 0x264   : > { %737 = vrot.lane.b32.xlu1 %v1615_v21, %s1416_s8 }
 0x2c2   : > { %v392_v25 = vpop.permute.xlu1 %391  ;;  %v504_v30 = vpop.permute.xlu0 %503 }
 0x2c3   : > { %v398_v26 = vsel %vm393_vm2, %v392_v25, 0 }
 0x2c4   : > { %1091 = vmatpush3.bf16.xpose.msra.mxu1 %v398_v26 }
 0x2c5   : > { %1102 = vmatprep.subr.bf16.mxu1 %v1408_v8 }
 0x2c6   : > { %v506_v27 = vpop.permute.xlu1 %505 }
 0x2c7   : > { %v511_v28 = vsel %vm393_vm2, %v506_v27, 0 }
 0x2ca   : > { %v623_v29 = vpop.permute.xlu1 %622 }
 0x2cb   : > { %1093 = vmatmul.mubr.msk.bf16.vlgmr.msra.gmra.mxu1 %vm393_vm2, %v1615_v21  ;;  %v628_v32 = vsel %vm393_vm2, %v623_v29, 0 }
 0x2cc   : > { %1103 = vmatpush3.bf16.xpose.msra.mxu1 %v511_v28  ;;  %1104 = vmatprep.mubr.msk.bf16.mxu1 %vm1409_vm1, %v1408_v8 }
 0x2cd   : > { %1114 = vmatprep.subr.bf16.mxu1 %v1408_v8 }
 0x2ce   : > { %v621_v31 = vpop.permute.xlu1 %620 }
 0x2d2   : > { %v740_v33 = vpop.permute.xlu1 %739 }
 0x2d3   : > { %1105 = vmatmul.mubr.msk.bf16.vlgmr.msra.gmra.mxu1 %vm393_vm2, %v504_v30  ;;  %v745_v34 = vsel %vm393_vm2, %v740_v33, 0 }
 0x2d4   : > { %1115 = vmatpush3.bf16.xpose.msra.mxu1 %v628_v32  ;;  %1116 = vmatprep.mubr.msk.bf16.mxu1 %vm1409_vm1, %v1408_v8 }
 0x2d5   : > { %1126 = vmatprep.subr.bf16.mxu1 %v1408_v8 }
 0x2d6   : > { %v738_v35 = vpop.permute.xlu1 %737 }
 0x2db   : > { %1117 = vmatmul.mubr.msk.bf16.vlgmr.msra.gmra.mxu1 %vm393_vm2, %v621_v31 }
 0x2dc   : > { %1127 = vmatpush3.bf16.xpose.msra.mxu1 %v745_v34  ;;  %1128 = vmatprep.mubr.msk.bf16.mxu1 %vm1409_vm1, %v1408_v8 }
 0x2dd   : > { %1138 = vmatprep.subr.bf16.mxu1 %v1408_v8 }
 0x2e3   : > { %1129 = vmatmul.mubr.msk.bf16.vlgmr.msra.gmra.mxu1 %vm393_vm2, %v738_v35 }
 0x2e4   : > { %1142 = vmatprep.mubr.msk.bf16.mxu1 %vm1409_vm1, %v1408_v8 }
 0x38b   : > { %v434_v36 = vpop.f32.mrf.mxu1 }
 0x38c   : > { %v440_v37 = vmul.f32 0.35355338, %v434_v36 }
 0x38d   : > { %v1094_v38 = vpop.f32.mrf.mxu1 }
 0x38e   : > { %v441_v39 = vsel %vm393_vm2, %v440_v37, -inf }
 0x38f   : > { %442 = vmax.xlane.f32.xlu1 %v441_v39  ;;  %v437_v40 = vpop.f32.mrf.mxu1 }
 0x391   : > { %v1095_v41 = vpop.f32.mrf.mxu1 }
 0x393   : > { %v547_v42 = vpop.f32.mrf.mxu1 }
 0x394   : > { %v553_v43 = vmul.f32 0.35355338, %v547_v42 }
 0x395   : > { %v1106_v44 = vpop.f32.mrf.mxu1 }
 0x396   : > { %v554_v45 = vsel %vm393_vm2, %v553_v43, -inf }
 0x397   : > { %555 = vmax.xlane.f32.xlu0 %v554_v45  ;;  %v550_v46 = vpop.f32.mrf.mxu1 }
 0x399   : > { %v1107_v47 = vpop.f32.mrf.mxu1 }
 0x39b   : > { %v664_v48 = vpop.f32.mrf.mxu1 }
 0x39c   : > { %v670_v49 = vmul.f32 0.35355338, %v664_v48 }
 0x39d   : > { %v1118_v50 = vpop.f32.mrf.mxu1 }
 0x39e   : > { %v671_v51 = vsel %vm393_vm2, %v670_v49, -inf  ;;  %v1233_v50 = vld [vmem:[#allocation8 + $0x8] sm:$0xff]  }
 0x39f   : > { %672 = vmax.xlane.f32.xlu1 %v671_v51  ;;  %v667_v52 = vpop.f32.mrf.mxu1  ;;  %1139 = vmatpush3.bf16.msra.mxu1 %v1233_v50  ;;  %v1234_v51 = vld [vmem:[#allocation8] sm:$0xff]  }
 0x3a0   : > { %1140 = vmatprep.subr.bf16.mxu1 %v1408_v8 }
 0x3a1   : > { %v1119_v53 = vpop.f32.mrf.mxu1 }
 0x3a3   : > { %v781_v54 = vpop.f32.mrf.mxu1  ;;  %1141 = vmatpush3.bf16.msra.mxu1 %v1234_v51 }
 0x3a4   : > { %v787_v55 = vmul.f32 0.35355338, %v781_v54 }
 0x3a5   : > { %v1130_v56 = vpop.f32.mrf.mxu1 }
 0x3a6   : > { %v788_v57 = vsel %vm393_vm2, %v787_v55, -inf }
 0x3a7   : > { %789 = vmax.xlane.f32.xlu0 %v788_v57  ;;  %v784_v58 = vpop.f32.mrf.mxu1 }
 0x3a9   : > { %v1131_v59 = vpop.f32.mrf.mxu1 }
 0x418   : > { %v443_v60 = vpop.xlane.xlu1 %442 }
 0x419   : > { %v444_v61 = vsub.f32 %v440_v37, %v443_v60 }
 0x41b   : > { %v445_v62 = vmul.f32 1.442695, %v444_v61 }
 0x41d   : > { %1237 = vpow2.f32 %v445_v62 }
 0x420   : > { %v556_v63 = vpop.xlane.xlu0 %555 }
 0x421   : > { %v557_v1 = vsub.f32 %v553_v43, %v556_v63 }
 0x423   : > { %v558_v2 = vmul.f32 1.442695, %v557_v1  ;;  %v1052_v1 = vld [vmem:[%s1736_s5] ss:$0 sm:$0xff] }
 0x425   : > { %1239 = vpow2.f32 %v558_v2 }
 0x428   : > { %v673_v13 = vpop.xlane.xlu1 %672 }
 0x429   : > { %v674_v14 = vsub.f32 %v670_v49, %v673_v13 }
 0x42a   : > { %v1238_v3 = vpop.eup %1237 }
 0x42b   : > { %v447_v4 = vsel %vm393_vm2, %v1238_v3, 0.0  ;;  %v675_v15 = vmul.f32 1.442695, %v674_v14 }
 0x42c   : > { %448 = vadd.xlane.f32.xlu1 %v447_v4 }
 0x430   : > { %v790_v5 = vpop.xlane.xlu0 %789 }
 0x431   : > { %v791_v6 = vsub.f32 %v787_v55, %v790_v5 }
 0x432   : > { %v1240_v7 = vpop.eup %1239 }
 0x433   : > { %v792_v9 = vmul.f32 1.442695, %v791_v6  ;;  %v560_v10 = vsel %vm393_vm2, %v1240_v7, 0.0 }
 0x434   : > { %561 = vadd.xlane.f32.xlu0 %v560_v10 }
 0x435   : > { %1241 = vpow2.f32 %v792_v9 }
 0x436   : > { %1243 = vpow2.f32 %v675_v15 }
 0x43d   : > { %453 = vrot.lane.b32.xlu1 %v1615_v21, %s1417_s14  ;;  %s1687_s14 = scalar_lea.hbm %s1737_s6, %s1057_s10 }
 0x442   : > { %v1242_v11 = vpop.eup %1241 }
 0x443   : > { %v794_v12 = vsel %vm393_vm2, %v1242_v11, 0.0  ;;  %v1244_v16 = vpop.eup %1243 }
 0x444   : > { %795 = vadd.xlane.f32.xlu0 %v794_v12  ;;  %v677_v17 = vsel %vm393_vm2, %v1244_v16, 0.0 }
 0x45a   : > { %566 = vrot.lane.b32.xlu0 %v1615_v21, %s1418_s26  ;;  %s1424_s26 = smov [#allocation9]  }
 0x461   : > { %678 = vadd.xlane.f32.xlu1 %v677_v17 }
 0x472   : > { %683 = vrot.lane.b32.xlu1 %v1615_v21, %s1419_s3  ;;  %s1337_s3 = sshll.u32 %s1424_s26, 4  ;;  %s1338_s3 = int_to_ptr.vmem [resolvable:$false] %s1337_s3 }
 0x473   : > { %p1340_p6 = scmp.lt.s32.totalorder %s1689_s9, %s1338_s3 }
 0x476   : > { %800 = vrot.lane.b32.xlu1 %v1615_v21, %s1420_s27  ;;  %s1339_s27 = scalar_lea.vmem %s1338_s3, 256 }
 0x477   : > { %p1341_p12 = scmp.lt.s32.totalorder %s1339_s27, %s1333_s20 }
 0x479   : > { %p1342_p7 = por %p1341_p12, %p1340_p6 }
 0x47b   : > { %p1343_p9 = pnand %p1342_p7, %p1336_p2 }
 0x4b5   : > { %v449_v18 = vpop.xlane.xlu1 %448 }
 0x4b6   : > { %1245 = vrcp.f32 %v449_v18 }
 0x4b9   : > { %v454_v19 = vpop.permute.xlu1 %453 }
 0x4ba   : > { %v460_v20 = vsel %vm458_vm3, %v454_v19, 0 }
 0x4bb   : > { %1097 = vmatpush3.bf16.msra.mxu0 %v460_v20 }
 0x4bc   : > { %1108 = vmatprep.subr.bf16.mxu0 %v1408_v8 }
 0x4bd   : > { %v562_v22 = vpop.xlane.xlu0 %561 }
 0x4be   : > { %1247 = vrcp.f32 %v562_v22 }
 0x4c3   : > { %v1246_v23 = vpop.eup %1245 }
 0x4c4   : > { %v451_v24 = vmul.f32 %v1246_v23, %v1238_v3 }
 0x4c6   : > { %v452_v25 = vpack.c.bf16 %v451_v24, %v451_v24 }
 0x4c8   : > { %1099 = vmatmul.mubr.msk.bf16.vlgmr.msra.gmra.mxu0 %vm393_vm2, %v452_v25 }
 0x4c9   : > { %1110 = vmatprep.mubr.msk.bf16.mxu0 %vm1409_vm1, %v1408_v8 }
 0x4cb   : > { %v1248_v21 = vpop.eup %1247 }
 0x4cc   : > { %v564_v27 = vmul.f32 %v1248_v21, %v1240_v7 }
 0x4cd   : > { %v796_v26 = vpop.xlane.xlu0 %795 }
 0x4ce   : > { %v565_v30 = vpack.c.bf16 %v564_v27, %v564_v27 }
 0x4d1   : > { %v567_v28 = vpop.permute.xlu0 %566 }
 0x4d2   : > { %v572_v29 = vsel %vm458_vm3, %v567_v28, 0 }
 0x4d3   : > { %1109 = vmatpush3.bf16.msra.mxu0 %v572_v29 }
 0x4d4   : > { %1120 = vmatprep.subr.bf16.mxu0 %v1408_v8 }
 0x4d6   : > { %1111 = vmatmul.mubr.msk.bf16.vlgmr.msra.gmra.mxu0 %vm393_vm2, %v565_v30 }
 0x4d7   : > { %1122 = vmatprep.mubr.msk.bf16.mxu0 %vm1409_vm1, %v1408_v8 }
 0x4ea   : > { %v679_v31 = vpop.xlane.xlu1 %678 }
 0x4eb   : > { %1249 = vrcp.f32 %v679_v31 }
 0x4ec   : > { %1251 = vrcp.f32 %v796_v26 }
 0x4ee   : > { %v684_v32 = vpop.permute.xlu1 %683 }
 0x4ef   : > { %v689_v33 = vsel %vm458_vm3, %v684_v32, 0 }
 0x4f0   : > { %1121 = vmatpush3.bf16.msra.mxu0 %v689_v33 }
 0x4f1   : > { %1132 = vmatprep.subr.bf16.mxu0 %v1408_v8 }
 0x4f2   : > { %v801_v36 = vpop.permute.xlu1 %800 }
 0x4f3   : > { %v806_v39 = vsel %vm458_vm3, %v801_v36, 0 }
 0x4f8   : > { %v1250_v34 = vpop.eup %1249 }
 0x4f9   : > { %v681_v35 = vmul.f32 %v1250_v34, %v1244_v16  ;;  %v1252_v38 = vpop.eup %1251 }
 0x4fa   : > { %v798_v40 = vmul.f32 %v1252_v38, %v1242_v11 }
 0x4fb   : > { %v682_v37 = vpack.c.bf16 %v681_v35, %v681_v35 }
 0x4fc   : > { %v799_v41 = vpack.c.bf16 %v798_v40, %v798_v40 }
 0x4fd   : > { %1123 = vmatmul.mubr.msk.bf16.vlgmr.msra.gmra.mxu0 %vm393_vm2, %v682_v37 }
 0x4fe   : > { %1133 = vmatpush3.bf16.msra.mxu0 %v806_v39  ;;  %1134 = vmatprep.mubr.msk.bf16.mxu0 %vm1409_vm1, %v1408_v8 }
 0x505   : > { %1135 = vmatmul.mubr.msk.bf16.vlgmr.msra.gmra.mxu0 %vm393_vm2, %v799_v41 }
 0x588   : > { %v496_v42 = vpop.f32.mrf.mxu0 }
 0x589   : > { %502 = vst.msk [vmem:[#allocation2] sm:$0xff] %vm393_vm2, %v496_v42 }
 0x58a   : > { %v1100_v43 = vpop.f32.mrf.mxu0 }
 0x58c   : > { %v499_v44 = vpop.f32.mrf.mxu0 }
 0x58e   : > { %v1101_v45 = vpop.f32.mrf.mxu0 }
 0x596   : > { %v608_v46 = vpop.f32.mrf.mxu0 }
 0x597   : > { %615 = vrot.lane.b32.xlu0 %v608_v46, %s1421_s29 }
 0x598   : > { %v1112_v47 = vpop.f32.mrf.mxu0 }
 0x59a   : > { %v611_v48 = vpop.f32.mrf.mxu0 }
 0x59c   : > { %v1113_v49 = vpop.f32.mrf.mxu0 }
 0x5bd   : > { %v725_v52 = vpop.f32.mrf.mxu0 }
 0x5be   : > { %732 = vrot.lane.b32.xlu1 %v725_v52, %s1422_s13 }
 0x5bf   : > { %v1124_v53 = vpop.f32.mrf.mxu0 }
 0x5c1   : > { %v728_v54 = vpop.f32.mrf.mxu0 }
 0x5c3   : > { %v1125_v55 = vpop.f32.mrf.mxu0 }
 0x5c5   : > { %v842_v56 = vpop.f32.mrf.mxu0 }
 0x5c6   : > { %849 = vrot.lane.b32.xlu0 %v842_v56, %s1423_s15 }
 0x5c7   : > { %v1136_v57 = vpop.f32.mrf.mxu0 }
 0x5c9   : > { %v845_v58 = vpop.f32.mrf.mxu0 }
 0x5cb   : > { %v1137_v59 = vpop.f32.mrf.mxu0 }
 0x609   : > { %v616_v60 = vpop.permute.xlu0 %615 }
 0x60a   : > { %619 = vst.msk [vmem:[#allocation2] sm:$0xff] %vm618_vm4, %v616_v60 }
 0x630   : > { %v733_v8 = vpop.permute.xlu1 %732 }
 0x631   : > { %736 = vst.msk [vmem:[#allocation2] sm:$0xff] %vm735_vm5, %v733_v8 }
 0x638   : > { %v850_v61 = vpop.permute.xlu0 %849 }
 0x639   : > { %853 = vst.msk [vmem:[#allocation2] sm:$0xff] %vm852_vm6, %v850_v61 }
 0x640   : > { %v854_v62 = vld [vmem:[#allocation2] sm:$0xff] }
 0x641   : > { %v855_v63 = vpack.c.bf16 %v854_v62, %v854_v62 }
 0x643   : > { %1143 = vmatmul.mubr.msk.bf16.vlgmr.msra.gmra.mxu1 %vm300_vm0, %v855_v63 }
 0x703   : > { %v916_v2 = vpop.f32.mrf.mxu1 }
 0x704   : > { %v917_v3 = vadd.f32 %v1052_v1, %v916_v2 }
 0x705   : > { %v1144_v4 = vpop.f32.mrf.mxu1 }
 0x706   : > { %v922_v5 = vadd.f32 %v917_v3, %v1592_v0 }
 0x707   : > { %v919_v6 = vpop.f32.mrf.mxu1 }
 0x708   : > { %923 = vst.msk [vmem:[%s295_s11] sm:$0xff] %vm300_vm0, %v922_v5 }
 0x709   : > { %v1145_v7 = vpop.f32.mrf.mxu1 }
 0x70a   : > { %1346 = shalt.err (!%p1343_p9)
}
 0x70b   : > { %s1347_s29 = scalar_lea.hbm %s1687_s14, 128  ;;  %s1351_s15 = scalar_lea.hbm %s1737_s6, 256 }
 0x70c   : > { %p1348_p13 = scmp.ne.s32.totalorder %s1687_s14, %s1347_s29  ;;  %p1352_p4 = scmp.lt.s32.totalorder %s1687_s14, %s1737_s6 }
 0x70d   : > { %p1353_p8 = scmp.lt.s32.totalorder %s1351_s15, %s1347_s29 }
 0x70e   : > { %p1349_p5 = pnand %p1348_p13, %p1755_p0 }
 0x70f   : > { %p1354_p3 = por %p1353_p8, %p1352_p4 }
 0x710   : > { %p1350_p10 = pneg %p1349_p5 }
 0x712   : > { %p1355_p11 = pnand %p1354_p3, %p1350_p10 }
 0x714   : > { %1358 = shalt.err (!%p1355_p11)
}
 0x715   : > { %1156 = dma.vmem_to_hbm [thread:$0]  (%p1755_p0), %s1689_s9, 128, %s1687_s14, %s925_s25  }
 0x716 PF: > { %s950_s10 = sand.u32 1, %s1389_s21   ;;  %p1756_p1 = scmp.ne.s32.totalorder %s1744_s28, 0 }
 0x717   : > { %p1757_p2 = scmp.ge.s32.totalorder %s1401_s24, 2  ;;  %s951_s11 = scalar_lea.sflag [#allocation5], %s950_s10 }
 0x719   : > { %p1170_p6 = pnand %p1757_p2, %p1756_p1 }
 0x71b   : > { %p1171_p12 = pneg %p1170_p6 }
 0x71d   : > { %1384 = dma.done.wait (%p1171_p12), %s951_s11, 128  }
 0x71e   : > { %1386 = vsyncadd (%p1171_p12), %s951_s11, 4294967168  ;;  %p20_p7 = scmp.ge.s32.totalorder %s1532_s19, 4   ;;  %s1758_s21 = smov %s1393_s22 }
 0x71f   : > { %s1759_s22 = smov %s1397_s23  ;;  %s1760_s23 = smov %s1548_s7 }
 0x720   : > { %s1761_s24 = smov %s1532_s19  ;;  %22 = sbr.rel (!%p20_p7) target bundleno = 8 (0x8), region = 97 }
 0x725   :  { %956 = vsyncpa [#allocation4], 1 }
 0x726   :  { %958 = vsyncpa [#allocation4 + $0x1], 1 }
 0x727   :  { %959 = vsyncpa [#allocation7], 1 }
 0x728   :  { %960 = vsyncpa [#allocation5], 1 }
 0x729   :  { %962 = vsyncpa [#allocation5 + $0x1], 1 }

// kernel: tpu_custom_call.1
= control target key start
LH: loop header
LB: loop body
LE: loop exit
PB: predicated region body
PF: predicated region fallthrough
CT: control target
= control target key end

     0   :  { %s1731_s0 = inlined_call_operand.hbm [shape: f32[2,8,32], index: 0, kind: input, shape index: {}]   ;;  %s1732_s1 = inlined_call_operand.vmem [shape: f32[1,32], index: 1, kind: input, shape index: {}]   ;;  %s1733_s2 = inlined_call_operand.vmem [shape: f32[1,32], index: 2, kind: input, shape index: {}]   ;;  %s1734_s3 = inlined_call_operand.hbm [shape: bf16[32,96], index: 3, kind: input, shape index: {}]   ;;  %s1735_s4 = inlined_call_operand.hbm [shape: bf16[32,32], index: 4, kind: input, shape index: {}]   ;;  %s1736_s5 = inlined_call_operand.vmem [shape: f32[1,32], index: 5, kind: input, shape index: {}]   ;;  %s1737_s6 = inlined_call_operand.hbm [shape: f32[2,8,32], index: 6, kind: output, shape index: {}]  }
   0x1   :  { %1742 = sst [smem:[#allocation13_spill]] %s1734_s3 }
   0x2   :  { %11 = vsyncpa [#allocation4], 0 }
   0x3   :  { %13 = vsyncpa [#allocation4 + $0x1], 0 }
   0x4   :  { %14 = vsyncpa [#allocation7], 0 }
   0x5   :  { %15 = vsyncpa [#allocation5], 0 }
   0x6   :  { %17 = vsyncpa [#allocation5 + $0x1], 0  ;;  %s1460_s21 = smov 0   ;;  %s1462_s22 = smov 0  }
   0x7   :  { %s1464_s23 = smov 0   ;;  %s1466_s24 = smov 0  }
   0x8 LB: > { %s1481_s25 = sadd.s32 4294967295, %s1401_s24   ;;  %s1027_s26 = sadd.s32 4294967294, %s1401_s24   ;;  %s1401_s24 = sphi %s1466_s24, %s1761_s24   ;;  %s1397_s23 = sphi %s1464_s23, %s1760_s23   ;;  %s1393_s22 = sphi %s1462_s22, %s1759_s22   ;;  %s1389_s21 = sphi %s1460_s21, %s1758_s21  }
   0x9   : > { %p43_p0 = scmp.ne.s32.totalorder %s1393_s22, %s1389_s21  ;;  %p1738_p1 = scmp.eq.s32.totalorder %s1481_s25, 0 }
   0xa   : > { %p178_p3 = scmp.eq.s32.totalorder %s1027_s26, 1  ;;  %p1028_p5 = scmp.ge.s32.totalorder %s1401_s24, 1 }
   0xb   : > { %p1490_p4 = por %p1738_p1, %p43_p0  ;;  %p185_p7 = scmp.lt.s32.totalorder %s1401_s24, 3 }
   0xc   : > { %p1495_p6 = por %p178_p3, %p43_p0  ;;  %s1403_s30 = smov [#allocation6]  }
   0xd   : > { %s1743_s27 = scalar_select %p1490_p4, 1, 0 }
   0xe   : > { %s1744_s28 = scalar_select %p1495_p6, 1, 0 }
   0xf   : > { %p1500_p8 = pnand %p1028_p5, %p185_p7  ;;  %s203_s7 = sshll.u32 %s1403_s30, 4  ;;  %s204_s7 = int_to_ptr.vmem [resolvable:$true] %s203_s7 }
  0x10   : > { %s1404_s9 = smov [#allocation8]   ;;  %s1264_s11 = scalar_lea.vmem %s204_s7, 256 }
  0x11   : > { %s1745_s29 = scalar_select %p1500_p8, 1, 0 }
  0x12   : > { %p1158_p9 = pneg %p1500_p8  ;;  %s216_s10 = sshll.u32 %s1404_s9, 4  ;;  %s217_s10 = int_to_ptr.vmem [resolvable:$true] %s216_s10 }
  0x13   : > { %p1265_p13 = scmp.ne.s32.totalorder %s204_s7, %s1264_s11  ;;  %p1272_p5 = scmp.lt.s32.totalorder %s204_s7, %s204_s7 }
  0x14   : > { %p1509_p11 = pnand %p1158_p9, %p1738_p1  ;;  %p1273_p7 = scmp.lt.s32.totalorder %s1264_s11, %s1264_s11 }
  0x16   : > { %p1255_p12 = pneg %p1509_p11  ;;  %p1274_p10 = por %p1273_p7, %p1272_p5 }
  0x18   : > { %p1267_p0 = pnand %p1265_p13, %p1255_p12 }
  0x1a   : > { %p1268_p3 = pneg %p1267_p0 }
  0x1c   : > { %p1275_p9 = pnand %p1274_p10, %p1268_p3 }
  0x1e   : > { %1278 = shalt.err (!%p1275_p9)
}
  0x1f   : > { %s1405_s12 = smov 64   ;;  %s1406_s13 = smov 4  }
  0x20   : > { %s1747_s3 = sld [smem:[#allocation13_spill]]  ;;  %s1290_s16 = scalar_lea.vmem %s217_s10, 256 }
  0x21   : > { %p1291_p1 = scmp.ne.s32.totalorder %s217_s10, %s1290_s16  ;;  %p1298_p2 = scmp.lt.s32.totalorder %s217_s10, %s217_s10 }
  0x22   : > { %p1299_p6 = scmp.lt.s32.totalorder %s1290_s16, %s1290_s16 }
  0x23   : > { %p1293_p13 = pnand %p1291_p1, %p1255_p12 }
  0x24   : > { %p1300_p5 = por %p1299_p6, %p1298_p2 }
  0x25   : > { %p1294_p0 = pneg %p1293_p13 }
  0x26   : > { %1161 = dma.hbm_to_vmem [thread:$0]  (!%p1509_p11), %s1747_s3, 256, %s204_s7, [#allocation7], %s1405_s12, %s1405_s12, %s1406_s13  }
  0x27   : > { %p1301_p10 = pnand %p1300_p5, %p1294_p0 }
  0x29   : > { %1304 = shalt.err (!%p1301_p10)
}
  0x2a   : > { %1164 = dma.hbm_to_vmem [thread:$0]  (!%p1509_p11), %s1735_s4, 256, %s217_s10, [#allocation7], %s1405_s12, %s1405_s12, %s1406_s13  }
  0x2b   : > { %s1532_s19 = sadd.s32 1, %s1401_s24   ;;  %s30_s20 = sadd.s32 1, %s1397_s23 }
  0x2c   : > { %s27_s26 = ssub.s32 %s1401_s24, %s1532_s19  ;;  %p37_p1 = scmp.ne.s32.totalorder %s1397_s23, %s1393_s22 }
  0x2d   : > { %p28_p2 = scmp.eq.s32.totalorder %s27_s26, 0  ;;  %p38_p6 = scmp.eq.s32.totalorder %s1401_s24, 0 }
  0x2e   : > { %p1748_p12 = scmp.eq.s32.totalorder %s1481_s25, 1  ;;  %p1175_p7 = scmp.lt.s32.totalorder %s1401_s24, 2 }
  0x2f   : > { %s1548_s7 = scalar_select %p28_p2, %s1397_s23, %s30_s20  }
  0x30   : > { %p1542_p3 = por %p1748_p12, %p37_p1  ;;  %p39_p9 = por %p38_p6, %p37_p1 }
  0x31   : > { %s233_s8 = sand.u32 1, %s1397_s23   ;;  %s1033_s10 = sshll.u32 %s1401_s24, 7 }
  0x32   : > { %s1749_s30 = scalar_select %p1542_p3, 1, 0 }
  0x33   : > { %s1032_s9 = sshll.u32 %s233_s8, 3  ;;  %s1555_s13 = scalar_lea.hbm %s1731_s0, %s1033_s10 }
  0x34   : > { %s237_s14 = scalar_lea.vmem [#allocation3], %s1032_s9  ;;  %p1557_p11 = pnand %p1175_p7, %p39_p9 }
  0x35   : > { %s244_s15 = sshll.u32 %s237_s14, 4  ;;  %s234_s17 = scalar_lea.sflag [#allocation4], %s233_s8  ;;  %s245_s15 = int_to_ptr.vmem [resolvable:$true] %s244_s15 }
  0x36   : > { %s1305_s18 = scalar_lea.hbm %s1555_s13, 128  ;;  %p1307_p0 = pneg %p1557_p11 }
  0x37   : > { %p1306_p13 = scmp.ne.s32.totalorder %s1555_s13, %s1305_s18  ;;  %s1310_s10 = scalar_lea.hbm %s1731_s0, 256 }
  0x38   : > { %p1311_p1 = scmp.lt.s32.totalorder %s1555_s13, %s1731_s0  ;;  %p1312_p2 = scmp.lt.s32.totalorder %s1310_s10, %s1305_s18 }
  0x39   : > { %p1308_p5 = pnand %p1307_p0, %p1306_p13 }
  0x3a   : > { %p1313_p6 = por %p1312_p2, %p1311_p1 }
  0x3b   : > { %p1309_p10 = pneg %p1308_p5 }
  0x3d   : > { %p1314_p12 = pnand %p1313_p6, %p1309_p10 }
  0x3f   : > { %1317 = shalt.err (!%p1314_p12)
}
  0x40   : > { %s1318_s12 = scalar_lea.vmem %s245_s15, 128  ;;  %s1407_s8 = smov [#allocation3]  }
  0x41   : > { %p1319_p7 = scmp.ne.s32.totalorder %s245_s15, %s1318_s12  ;;  %s1323_s14 = sshll.u32 %s1407_s8, 4  ;;  %s1324_s14 = int_to_ptr.vmem [resolvable:$false] %s1323_s14 }
  0x42   : > { %s1325_s3 = scalar_lea.vmem %s1324_s14, 256  ;;  %p1326_p13 = scmp.lt.s32.totalorder %s245_s15, %s1324_s14 }
  0x43   : > { %p1321_p9 = pnand %p1319_p7, %p1307_p0  ;;  %p1327_p5 = scmp.lt.s32.totalorder %s1325_s3, %s1318_s12 }
  0x45   : > { %p1322_p3 = pneg %p1321_p9  ;;  %p1328_p4 = por %p1327_p5, %p1326_p13 }
  0x47   : > { %p1329_p8 = pnand %p1328_p4, %p1322_p3 }
  0x49   : > { %1332 = shalt.err (!%p1329_p8)
}
  0x4a   : > { %1168 = dma.hbm_to_vmem [thread:$0]  (!%p1557_p11), %s1555_s13, 128, %s245_s15, %s234_s17  }
  0x4b   : > { %p1751_p10 = scmp.ne.s32.totalorder %s1745_s29, 0 }
  0x4c   : > { %s1578_s18 = sand.u32 (!%p1751_p10), 1, %s1393_s22   ;;  %p1752_p4 = scmp.ne.s32.totalorder (!%p1751_p10), %s1743_s27, 0 }
  0x4d   : > { %253 = sbr.rel (%p1751_p10) target bundleno = 1814 (0x716), region = 44  ;;  %s1035_s20 = sshll.u32 (!%p1751_p10), %s1578_s18, 3 }
  0x4e   : > { %s256_s26 = scalar_lea.sflag (!%p1751_p10), [#allocation4], %s1578_s18  ;;  %s259_s3 = scalar_lea.vmem (!%p1751_p10), [#allocation3], %s1035_s20 }
  0x52   : > { %1376 = dma.done.wait (%p1752_p4), %s256_s26, 128  }
  0x53   : > { %1378 = vsyncadd (%p1752_p4), %s256_s26, 4294967168  ;;  %p1753_p8 = scmp.eq.s32.totalorder %s1481_s25, 0 }
  0x55   : > { %1380 = dma.done.wait (%p1753_p8), [#allocation7], 512   ;;  %p1754_p3 = pmov %p1753_p8 }
  0x56   : > { %vm300_vm0 = vcmask 261120   ;;  %v1592_v0 = vld [vmem:[%s259_s3] sm:$0xff]  ;;  %v1231_v7 = vld [vmem:[#allocation6 + $0x8] sm:$0xff]   ;;  %v1408_v8 = vmov 0.0   ;;  %vm1409_vm1 = vmmov 0   ;;  %v1232_v9 = vld [vmem:[#allocation6] sm:$0xff]  }
  0x57   : > { %1382 = vsyncadd (%p1754_p3), [#allocation7], 4294966784  ;;  %v301_v1 = vsel %vm300_vm0, %v1592_v0, 0.0  ;;  %1082 = vmatprep.subr.bf16.mxu0 %v1408_v8  ;;  %1086 = vmatprep.mubr.msk.bf16.mxu0 %vm1409_vm1, %v1408_v8  ;;  %v1039_v14 = vld [vmem:[%s1732_s1] ss:$0 sm:$0xff]  ;;  %s1410_s16 = smov 120  }
  0x58   : > { %302 = vadd.xlane.f32.xlu0 %v301_v1  ;;  %1083 = vmatpush3.bf16.msra.mxu0 %v1231_v7  ;;  %v1040_v16 = vld [vmem:[%s1733_s2] ss:$0 sm:$0xff]  ;;  %s1411_s17 = smov 96   ;;  %s1412_s10 = smov 88   ;;  %vm393_vm2 = vcmask 64512   ;;  %vm458_vm3 = vcmask 1043456  }
  0x59   : > { %1090 = vmatprep.subr.bf16.mxu1 %v1408_v8  ;;  %1084 = vmatprep.subr.bf16.mxu0 %v1408_v8  ;;  %s1413_s11 = smov 80   ;;  %s1414_s9 = smov 112   ;;  %vm618_vm4 = vcmask 130112   ;;  %vm735_vm5 = vcmask 195712   ;;  %vm852_vm6 = vcmask 261312  }
  0x5a   : > { %1092 = vmatprep.mubr.msk.bf16.mxu1 %vm1409_vm1, %v1408_v8  ;;  %s1415_s12 = smov 72   ;;  %s1416_s8 = smov 104  }
  0x5b   : > { %s1417_s14 = smov 64   ;;  %s1418_s26 = smov 56  }
  0x5c   : > { %1085 = vmatpush3.bf16.msra.mxu0 %v1232_v9  ;;  %s1419_s3 = smov 48   ;;  %s1420_s27 = smov 40  }
  0x5d   : > { %1096 = vmatprep.subr.bf16.mxu0 %v1408_v8  ;;  %s1421_s29 = smov 8   ;;  %s1422_s13 = smov 16  }
  0x5e   : > { %s1423_s15 = smov 24   ;;  %p1755_p0 = scmp.ne.s32.totalorder %s1749_s30, 0 }
  0xe1   : > { %v303_v2 = vpop.xlane.xlu0 %302 }
  0xe2   : > { %v305_v3 = vmul.f32 0.03125, %v303_v2 }
  0xe4   : > { %v306_v4 = vsub.f32 %v1592_v0, %v305_v3 }
  0xe6   : > { %v307_v5 = vmul.f32 %v306_v4, %v306_v4 }
  0xe8   : > { %v308_v6 = vsel %vm300_vm0, %v307_v5, 0.0 }
  0xe9   : > { %309 = vadd.xlane.f32.xlu0 %v308_v6 }
 0x172   : > { %v310_v10 = vpop.xlane.xlu0 %309 }
 0x173   : > { %v311_v11 = vmul.f32 0.03125, %v310_v10 }
 0x175   : > { %v312_v12 = vadd.f32 1e-05, %v311_v11 }
 0x177   : > { %1235 = vrsqrt.f32 %v312_v12 }
 0x184   : > { %v1236_v13 = vpop.eup %1235 }
 0x185   : > { %v314_v15 = vmul.f32 %v1236_v13, %v306_v4 }
 0x187   : > { %v321_v17 = vmul.f32 %v1039_v14, %v314_v15 }
 0x189   : > { %v328_v18 = vadd.f32 %v1040_v16, %v321_v17 }
 0x18b   : > { %v329_v19 = vpack.c.bf16 %v328_v18, %v328_v18 }
 0x18d   : > { %1087 = vmatmul.mubr.msk.bf16.vlgmr.msra.gmra.mxu0 %vm300_vm0, %v329_v19 }
 0x18e   : > { %1098 = vmatprep.mubr.msk.bf16.mxu0 %vm1409_vm1, %v1408_v8 }
 0x24d   : > { %v383_v20 = vpop.f32.mrf.mxu0 }
 0x24e   : > { %v1615_v21 = vpack.c.bf16 %v383_v20, %v383_v20 }
 0x24f   : > { %v1088_v22 = vpop.f32.mrf.mxu0 }
 0x250   : > { %503 = vrot.lane.b32.xlu0 %v1615_v21, %s1410_s16  ;;  %391 = vrot.lane.b32.xlu1 %v1615_v21, %s1411_s17 }
 0x251   : > { %v386_v23 = vpop.f32.mrf.mxu0 }
 0x253   : > { %v1089_v24 = vpop.f32.mrf.mxu0 }
 0x254   : > { %505 = vrot.lane.b32.xlu1 %v1615_v21, %s1412_s10  ;;  %s1057_s10 = sshll.u32 %s1481_s25, 7  ;;  %s925_s25 = scalar_lea.sflag [#allocation5], %s1578_s18 }
 0x258   : > { %622 = vrot.lane.b32.xlu1 %v1615_v21, %s1413_s11  ;;  %s295_s11 = scalar_lea.vmem [#allocation9], %s1035_s20 }
 0x25c   : > { %620 = vrot.lane.b32.xlu1 %v1615_v21, %s1414_s9  ;;  %s938_s9 = sshll.u32 %s295_s11, 4  ;;  %s1689_s9 = int_to_ptr.vmem [resolvable:$true] %s938_s9 }
 0x25d   : > { %s1333_s20 = scalar_lea.vmem %s1689_s9, 128 }
 0x25e   : > { %p1334_p11 = scmp.ne.s32.totalorder %s1689_s9, %s1333_s20 }
 0x260   : > { %739 = vrot.lane.b32.xlu1 %v1615_v21, %s1415_s12  ;;  %p1335_p1 = pnand %p1334_p11, %p1755_p0 }
 0x262   : > { %p1336_p2 = pneg %p1335_p1 }
 0x264   : > { %737 = vrot.lane.b32.xlu1 %v1615_v21, %s1416_s8 }
 0x2c2   : > { %v392_v25 = vpop.permute.xlu1 %391  ;;  %v504_v30 = vpop.permute.xlu0 %503 }
 0x2c3   : > { %v398_v26 = vsel %vm393_vm2, %v392_v25, 0 }
 0x2c4   : > { %1091 = vmatpush3.bf16.xpose.msra.mxu1 %v398_v26 }
 0x2c5   : > { %1102 = vmatprep.subr.bf16.mxu1 %v1408_v8 }
 0x2c6   : > { %v506_v27 = vpop.permute.xlu1 %505 }
 0x2c7   : > { %v511_v28 = vsel %vm393_vm2, %v506_v27, 0 }
 0x2ca   : > { %v623_v29 = vpop.permute.xlu1 %622 }
 0x2cb   : > { %1093 = vmatmul.mubr.msk.bf16.vlgmr.msra.gmra.mxu1 %vm393_vm2, %v1615_v21  ;;  %v628_v32 = vsel %vm393_vm2, %v623_v29, 0 }
 0x2cc   : > { %1103 = vmatpush3.bf16.xpose.msra.mxu1 %v511_v28  ;;  %1104 = vmatprep.mubr.msk.bf16.mxu1 %vm1409_vm1, %v1408_v8 }
 0x2cd   : > { %1114 = vmatprep.subr.bf16.mxu1 %v1408_v8 }
 0x2ce   : > { %v621_v31 = vpop.permute.xlu1 %620 }
 0x2d2   : > { %v740_v33 = vpop.permute.xlu1 %739 }
 0x2d3   : > { %1105 = vmatmul.mubr.msk.bf16.vlgmr.msra.gmra.mxu1 %vm393_vm2, %v504_v30  ;;  %v745_v34 = vsel %vm393_vm2, %v740_v33, 0 }
 0x2d4   : > { %1115 = vmatpush3.bf16.xpose.msra.mxu1 %v628_v32  ;;  %1116 = vmatprep.mubr.msk.bf16.mxu1 %vm1409_vm1, %v1408_v8 }
 0x2d5   : > { %1126 = vmatprep.subr.bf16.mxu1 %v1408_v8 }
 0x2d6   : > { %v738_v35 = vpop.permute.xlu1 %737 }
 0x2db   : > { %1117 = vmatmul.mubr.msk.bf16.vlgmr.msra.gmra.mxu1 %vm393_vm2, %v621_v31 }
 0x2dc   : > { %1127 = vmatpush3.bf16.xpose.msra.mxu1 %v745_v34  ;;  %1128 = vmatprep.mubr.msk.bf16.mxu1 %vm1409_vm1, %v1408_v8 }
 0x2dd   : > { %1138 = vmatprep.subr.bf16.mxu1 %v1408_v8 }
 0x2e3   : > { %1129 = vmatmul.mubr.msk.bf16.vlgmr.msra.gmra.mxu1 %vm393_vm2, %v738_v35 }
 0x2e4   : > { %1142 = vmatprep.mubr.msk.bf16.mxu1 %vm1409_vm1, %v1408_v8 }
 0x38b   : > { %v434_v36 = vpop.f32.mrf.mxu1 }
 0x38c   : > { %v440_v37 = vmul.f32 0.35355338, %v434_v36 }
 0x38d   : > { %v1094_v38 = vpop.f32.mrf.mxu1 }
 0x38e   : > { %v441_v39 = vsel %vm393_vm2, %v440_v37, -inf }
 0x38f   : > { %442 = vmax.xlane.f32.xlu1 %v441_v39  ;;  %v437_v40 = vpop.f32.mrf.mxu1 }
 0x391   : > { %v1095_v41 = vpop.f32.mrf.mxu1 }
 0x393   : > { %v547_v42 = vpop.f32.mrf.mxu1 }
 0x394   : > { %v553_v43 = vmul.f32 0.35355338, %v547_v42 }
 0x395   : > { %v1106_v44 = vpop.f32.mrf.mxu1 }
 0x396   : > { %v554_v45 = vsel %vm393_vm2, %v553_v43, -inf }
 0x397   : > { %555 = vmax.xlane.f32.xlu0 %v554_v45  ;;  %v550_v46 = vpop.f32.mrf.mxu1 }
 0x399   : > { %v1107_v47 = vpop.f32.mrf.mxu1 }
 0x39b   : > { %v664_v48 = vpop.f32.mrf.mxu1 }
 0x39c   : > { %v670_v49 = vmul.f32 0.35355338, %v664_v48 }
 0x39d   : > { %v1118_v50 = vpop.f32.mrf.mxu1 }
 0x39e   : > { %v671_v51 = vsel %vm393_vm2, %v670_v49, -inf  ;;  %v1233_v50 = vld [vmem:[#allocation8 + $0x8] sm:$0xff]  }
 0x39f   : > { %672 = vmax.xlane.f32.xlu1 %v671_v51  ;;  %v667_v52 = vpop.f32.mrf.mxu1  ;;  %1139 = vmatpush3.bf16.msra.mxu1 %v1233_v50  ;;  %v1234_v51 = vld [vmem:[#allocation8] sm:$0xff]  }
 0x3a0   : > { %1140 = vmatprep.subr.bf16.mxu1 %v1408_v8 }
 0x3a1   : > { %v1119_v53 = vpop.f32.mrf.mxu1 }
 0x3a3   : > { %v781_v54 = vpop.f32.mrf.mxu1  ;;  %1141 = vmatpush3.bf16.msra.mxu1 %v1234_v51 }
 0x3a4   : > { %v787_v55 = vmul.f32 0.35355338, %v781_v54 }
 0x3a5   : > { %v1130_v56 = vpop.f32.mrf.mxu1 }
 0x3a6   : > { %v788_v57 = vsel %vm393_vm2, %v787_v55, -inf }
 0x3a7   : > { %789 = vmax.xlane.f32.xlu0 %v788_v57  ;;  %v784_v58 = vpop.f32.mrf.mxu1 }
 0x3a9   : > { %v1131_v59 = vpop.f32.mrf.mxu1 }
 0x418   : > { %v443_v60 = vpop.xlane.xlu1 %442 }
 0x419   : > { %v444_v61 = vsub.f32 %v440_v37, %v443_v60 }
 0x41b   : > { %v445_v62 = vmul.f32 1.442695, %v444_v61 }
 0x41d   : > { %1237 = vpow2.f32 %v445_v62 }
 0x420   : > { %v556_v63 = vpop.xlane.xlu0 %555 }
 0x421   : > { %v557_v1 = vsub.f32 %v553_v43, %v556_v63 }
 0x423   : > { %v558_v2 = vmul.f32 1.442695, %v557_v1  ;;  %v1052_v1 = vld [vmem:[%s1736_s5] ss:$0 sm:$0xff] }
 0x425   : > { %1239 = vpow2.f32 %v558_v2 }
 0x428   : > { %v673_v13 = vpop.xlane.xlu1 %672 }
 0x429   : > { %v674_v14 = vsub.f32 %v670_v49, %v673_v13 }
 0x42a   : > { %v1238_v3 = vpop.eup %1237 }
 0x42b   : > { %v447_v4 = vsel %vm393_vm2, %v1238_v3, 0.0  ;;  %v675_v15 = vmul.f32 1.442695, %v674_v14 }
 0x42c   : > { %448 = vadd.xlane.f32.xlu1 %v447_v4 }
 0x430   : > { %v790_v5 = vpop.xlane.xlu0 %789 }
 0x431   : > { %v791_v6 = vsub.f32 %v787_v55, %v790_v5 }
 0x432   : > { %v1240_v7 = vpop.eup %1239 }
 0x433   : > { %v792_v9 = vmul.f32 1.442695, %v791_v6  ;;  %v560_v10 = vsel %vm393_vm2, %v1240_v7, 0.0 }
 0x434   : > { %561 = vadd.xlane.f32.xlu0 %v560_v10 }
 0x435   : > { %1241 = vpow2.f32 %v792_v9 }
 0x436   : > { %1243 = vpow2.f32 %v675_v15 }
 0x43d   : > { %453 = vrot.lane.b32.xlu1 %v1615_v21, %s1417_s14  ;;  %s1687_s14 = scalar_lea.hbm %s1737_s6, %s1057_s10 }
 0x442   : > { %v1242_v11 = vpop.eup %1241 }
 0x443   : > { %v794_v12 = vsel %vm393_vm2, %v1242_v11, 0.0  ;;  %v1244_v16 = vpop.eup %1243 }
 0x444   : > { %795 = vadd.xlane.f32.xlu0 %v794_v12  ;;  %v677_v17 = vsel %vm393_vm2, %v1244_v16, 0.0 }
 0x45a   : > { %566 = vrot.lane.b32.xlu0 %v1615_v21, %s1418_s26  ;;  %s1424_s26 = smov [#allocation9]  }
 0x461   : > { %678 = vadd.xlane.f32.xlu1 %v677_v17 }
 0x472   : > { %683 = vrot.lane.b32.xlu1 %v1615_v21, %s1419_s3  ;;  %s1337_s3 = sshll.u32 %s1424_s26, 4  ;;  %s1338_s3 = int_to_ptr.vmem [resolvable:$false] %s1337_s3 }
 0x473   : > { %p1340_p6 = scmp.lt.s32.totalorder %s1689_s9, %s1338_s3 }
 0x476   : > { %800 = vrot.lane.b32.xlu1 %v1615_v21, %s1420_s27  ;;  %s1339_s27 = scalar_lea.vmem %s1338_s3, 256 }
 0x477   : > { %p1341_p12 = scmp.lt.s32.totalorder %s1339_s27, %s1333_s20 }
 0x479   : > { %p1342_p7 = por %p1341_p12, %p1340_p6 }
 0x47b   : > { %p1343_p9 = pnand %p1342_p7, %p1336_p2 }
 0x4b5   : > { %v449_v18 = vpop.xlane.xlu1 %448 }
 0x4b6   : > { %1245 = vrcp.f32 %v449_v18 }
 0x4b9   : > { %v454_v19 = vpop.permute.xlu1 %453 }
 0x4ba   : > { %v460_v20 = vsel %vm458_vm3, %v454_v19, 0 }
 0x4bb   : > { %1097 = vmatpush3.bf16.msra.mxu0 %v460_v20 }
 0x4bc   : > { %1108 = vmatprep.subr.bf16.mxu0 %v1408_v8 }
 0x4bd   : > { %v562_v22 = vpop.xlane.xlu0 %561 }
 0x4be   : > { %1247 = vrcp.f32 %v562_v22 }
 0x4c3   : > { %v1246_v23 = vpop.eup %1245 }
 0x4c4   : > { %v451_v24 = vmul.f32 %v1246_v23, %v1238_v3 }
 0x4c6   : > { %v452_v25 = vpack.c.bf16 %v451_v24, %v451_v24 }
 0x4c8   : > { %1099 = vmatmul.mubr.msk.bf16.vlgmr.msra.gmra.mxu0 %vm393_vm2, %v452_v25 }
 0x4c9   : > { %1110 = vmatprep.mubr.msk.bf16.mxu0 %vm1409_vm1, %v1408_v8 }
 0x4cb   : > { %v1248_v21 = vpop.eup %1247 }
 0x4cc   : > { %v564_v27 = vmul.f32 %v1248_v21, %v1240_v7 }
 0x4cd   : > { %v796_v26 = vpop.xlane.xlu0 %795 }
 0x4ce   : > { %v565_v30 = vpack.c.bf16 %v564_v27, %v564_v27 }
 0x4d1   : > { %v567_v28 = vpop.permute.xlu0 %566 }
 0x4d2   : > { %v572_v29 = vsel %vm458_vm3, %v567_v28, 0 }
 0x4d3   : > { %1109 = vmatpush3.bf16.msra.mxu0 %v572_v29 }
 0x4d4   : > { %1120 = vmatprep.subr.bf16.mxu0 %v1408_v8 }
 0x4d6   : > { %1111 = vmatmul.mubr.msk.bf16.vlgmr.msra.gmra.mxu0 %vm393_vm2, %v565_v30 }
 0x4d7   : > { %1122 = vmatprep.mubr.msk.bf16.mxu0 %vm1409_vm1, %v1408_v8 }
 0x4ea   : > { %v679_v31 = vpop.xlane.xlu1 %678 }
 0x4eb   : > { %1249 = vrcp.f32 %v679_v31 }
 0x4ec   : > { %1251 = vrcp.f32 %v796_v26 }
 0x4ee   : > { %v684_v32 = vpop.permute.xlu1 %683 }
 0x4ef   : > { %v689_v33 = vsel %vm458_vm3, %v684_v32, 0 }
 0x4f0   : > { %1121 = vmatpush3.bf16.msra.mxu0 %v689_v33 }
 0x4f1   : > { %1132 = vmatprep.subr.bf16.mxu0 %v1408_v8 }
 0x4f2   : > { %v801_v36 = vpop.permute.xlu1 %800 }
 0x4f3   : > { %v806_v39 = vsel %vm458_vm3, %v801_v36, 0 }
 0x4f8   : > { %v1250_v34 = vpop.eup %1249 }
 0x4f9   : > { %v681_v35 = vmul.f32 %v1250_v34, %v1244_v16  ;;  %v1252_v38 = vpop.eup %1251 }
 0x4fa   : > { %v798_v40 = vmul.f32 %v1252_v38, %v1242_v11 }
 0x4fb   : > { %v682_v37 = vpack.c.bf16 %v681_v35, %v681_v35 }
 0x4fc   : > { %v799_v41 = vpack.c.bf16 %v798_v40, %v798_v40 }
 0x4fd   : > { %1123 = vmatmul.mubr.msk.bf16.vlgmr.msra.gmra.mxu0 %vm393_vm2, %v682_v37 }
 0x4fe   : > { %1133 = vmatpush3.bf16.msra.mxu0 %v806_v39  ;;  %1134 = vmatprep.mubr.msk.bf16.mxu0 %vm1409_vm1, %v1408_v8 }
 0x505   : > { %1135 = vmatmul.mubr.msk.bf16.vlgmr.msra.gmra.mxu0 %vm393_vm2, %v799_v41 }
 0x588   : > { %v496_v42 = vpop.f32.mrf.mxu0 }
 0x589   : > { %502 = vst.msk [vmem:[#allocation2] sm:$0xff] %vm393_vm2, %v496_v42 }
 0x58a   : > { %v1100_v43 = vpop.f32.mrf.mxu0 }
 0x58c   : > { %v499_v44 = vpop.f32.mrf.mxu0 }
 0x58e   : > { %v1101_v45 = vpop.f32.mrf.mxu0 }
 0x596   : > { %v608_v46 = vpop.f32.mrf.mxu0 }
 0x597   : > { %615 = vrot.lane.b32.xlu0 %v608_v46, %s1421_s29 }
 0x598   : > { %v1112_v47 = vpop.f32.mrf.mxu0 }
 0x59a   : > { %v611_v48 = vpop.f32.mrf.mxu0 }
 0x59c   : > { %v1113_v49 = vpop.f32.mrf.mxu0 }
 0x5bd   : > { %v725_v52 = vpop.f32.mrf.mxu0 }
 0x5be   : > { %732 = vrot.lane.b32.xlu1 %v725_v52, %s1422_s13 }
 0x5bf   : > { %v1124_v53 = vpop.f32.mrf.mxu0 }
 0x5c1   : > { %v728_v54 = vpop.f32.mrf.mxu0 }
 0x5c3   : > { %v1125_v55 = vpop.f32.mrf.mxu0 }
 0x5c5   : > { %v842_v56 = vpop.f32.mrf.mxu0 }
 0x5c6   : > { %849 = vrot.lane.b32.xlu0 %v842_v56, %s1423_s15 }
 0x5c7   : > { %v1136_v57 = vpop.f32.mrf.mxu0 }
 0x5c9   : > { %v845_v58 = vpop.f32.mrf.mxu0 }
 0x5cb   : > { %v1137_v59 = vpop.f32.mrf.mxu0 }
 0x609   : > { %v616_v60 = vpop.permute.xlu0 %615 }
 0x60a   : > { %619 = vst.msk [vmem:[#allocation2] sm:$0xff] %vm618_vm4, %v616_v60 }
 0x630   : > { %v733_v8 = vpop.permute.xlu1 %732 }
 0x631   : > { %736 = vst.msk [vmem:[#allocation2] sm:$0xff] %vm735_vm5, %v733_v8 }
 0x638   : > { %v850_v61 = vpop.permute.xlu0 %849 }
 0x639   : > { %853 = vst.msk [vmem:[#allocation2] sm:$0xff] %vm852_vm6, %v850_v61 }
 0x640   : > { %v854_v62 = vld [vmem:[#allocation2] sm:$0xff] }
 0x641   : > { %v855_v63 = vpack.c.bf16 %v854_v62, %v854_v62 }
 0x643   : > { %1143 = vmatmul.mubr.msk.bf16.vlgmr.msra.gmra.mxu1 %vm300_vm0, %v855_v63 }
 0x703   : > { %v916_v2 = vpop.f32.mrf.mxu1 }
 0x704   : > { %v917_v3 = vadd.f32 %v1052_v1, %v916_v2 }
 0x705   : > { %v1144_v4 = vpop.f32.mrf.mxu1 }
 0x706   : > { %v922_v5 = vadd.f32 %v917_v3, %v1592_v0 }
 0x707   : > { %v919_v6 = vpop.f32.mrf.mxu1 }
 0x708   : > { %923 = vst.msk [vmem:[%s295_s11] sm:$0xff] %vm300_vm0, %v922_v5 }
 0x709   : > { %v1145_v7 = vpop.f32.mrf.mxu1 }
 0x70a   : > { %1346 = shalt.err (!%p1343_p9)
}
 0x70b   : > { %s1347_s29 = scalar_lea.hbm %s1687_s14, 128  ;;  %s1351_s15 = scalar_lea.hbm %s1737_s6, 256 }
 0x70c   : > { %p1348_p13 = scmp.ne.s32.totalorder %s1687_s14, %s1347_s29  ;;  %p1352_p4 = scmp.lt.s32.totalorder %s1687_s14, %s1737_s6 }
 0x70d   : > { %p1353_p8 = scmp.lt.s32.totalorder %s1351_s15, %s1347_s29 }
 0x70e   : > { %p1349_p5 = pnand %p1348_p13, %p1755_p0 }
 0x70f   : > { %p1354_p3 = por %p1353_p8, %p1352_p4 }
 0x710   : > { %p1350_p10 = pneg %p1349_p5 }
 0x712   : > { %p1355_p11 = pnand %p1354_p3, %p1350_p10 }
 0x714   : > { %1358 = shalt.err (!%p1355_p11)
}
 0x715   : > { %1156 = dma.vmem_to_hbm [thread:$0]  (%p1755_p0), %s1689_s9, 128, %s1687_s14, %s925_s25  }
 0x716 PF: > { %s950_s10 = sand.u32 1, %s1389_s21   ;;  %p1756_p1 = scmp.ne.s32.totalorder %s1744_s28, 0 }
 0x717   : > { %p1757_p2 = scmp.ge.s32.totalorder %s1401_s24, 2  ;;  %s951_s11 = scalar_lea.sflag [#allocation5], %s950_s10 }
 0x719   : > { %p1170_p6 = pnand %p1757_p2, %p1756_p1 }
 0x71b   : > { %p1171_p12 = pneg %p1170_p6 }
 0x71d   : > { %1384 = dma.done.wait (%p1171_p12), %s951_s11, 128  }
 0x71e   : > { %1386 = vsyncadd (%p1171_p12), %s951_s11, 4294967168  ;;  %p20_p7 = scmp.ge.s32.totalorder %s1532_s19, 4   ;;  %s1758_s21 = smov %s1393_s22 }
 0x71f   : > { %s1759_s22 = smov %s1397_s23  ;;  %s1760_s23 = smov %s1548_s7 }
 0x720   : > { %s1761_s24 = smov %s1532_s19  ;;  %22 = sbr.rel (!%p20_p7) target bundleno = 8 (0x8), region = 97 }
 0x725   :  { %956 = vsyncpa [#allocation4], 1 }
 0x726   :  { %958 = vsyncpa [#allocation4 + $0x1], 1 }
 0x727   :  { %959 = vsyncpa [#allocation7], 1 }
 0x728   :  { %960 = vsyncpa [#allocation5], 1 }
 0x729   :  { %962 = vsyncpa [#allocation5 + $0x1], 1 }

</bundles_post_ra>
